<compile_context>
chip_gen: v6e
topology: v6e:2x2x1
jax: 0.10.0
libtpu: 0.0.40
codegen_flags: <defaults>
</compile_context>

<pallas_src>
import math

import jax
import jax.numpy as jnp
from jax.experimental import pallas as pl
from jax.experimental.pallas import tpu as pltpu


def _dual_tower_kernel(xu_ref, w1_ref, w2a_ref, w2b_ref, w2c_ref, wm_ref,
                       b_ref, out1_ref, out2_ref):
    """Both MLP towers in one body (no grid).

    Weight refs carry a leading tower axis of size 2 (static integer index).
    b_ref is the packed (2, 1, h1+h2+h3+h4+adim) f32 bias buffer, sliced with
    static lane-aligned views. Matmuls run bf16 x bf16 on the MXU with f32
    accumulation; bias add / ReLU stay f32 on the VPU.
    """
    h1 = w1_ref.shape[2]
    h2 = w2a_ref.shape[2]
    h3 = w2b_ref.shape[2]
    h4 = w2c_ref.shape[2]
    adim = wm_ref.shape[2]
    # Static lane offsets of each bias segment inside the packed bias buffer
    # (0 / 128 / 384 / 896 / 1152 for d=8 -> all 128-aligned except the tiny
    # head segment, whose 4-lane masked read is negligible).
    o1, o2a, o2b, o2c, om = 0, h1, h1 + h2, h1 + h2 + h3, h1 + h2 + h3 + h4

    xu = xu_ref[...]
    out_refs = (out1_ref, out2_ref)

    def dot(a_f32, w_bf16):
        return jnp.dot(a_f32.astype(jnp.bfloat16), w_bf16,
                       preferred_element_type=jnp.float32)

    for t in range(2):  # statically unrolled: scheduler interleaves both towers
        def bias(off, width):
            return b_ref[t, :, off:off + width]  # (1, width) static view

        h = jnp.maximum(dot(xu, w1_ref[t]) + bias(o1, h1), 0.0)
        h = jnp.maximum(dot(h, w2a_ref[t]) + bias(o2a, h2), 0.0)
        h = jnp.maximum(dot(h, w2b_ref[t]) + bias(o2b, h3), 0.0)
        h = jnp.maximum(dot(h, w2c_ref[t]) + bias(o2c, h4), 0.0)
        out_refs[t][...] = dot(h, wm_ref[t]) + bias(om, adim)


def discrete_g_forward(state, preference, packed):
    """Pallas implementation of Discrete_G_Network.forward.

    state:      (B, num_inputs)      float32
    preference: (B, num_preferences) float32
    returns (x1, x2), each (B, action_dim) float32
    """
    B = state.shape[0]
    adim = packed["wm"].shape[2]
    d = packed["w1"].shape[1]
    h1 = packed["w1"].shape[2]
    h2 = packed["w2a"].shape[2]
    h3 = packed["w2b"].shape[2]
    h4 = packed["w2c"].shape[2]

    # Wrapper-side concat of two tiny (B, *) arrays is negligible and lets the
    # kernel use a single first-layer weight (one fewer DMA stream / MXU push).
    xu = jnp.concatenate([state, preference], axis=1).astype(jnp.float32)

    args = (xu, packed["w1"], packed["w2a"], packed["w2b"], packed["w2c"],
            packed["wm"], packed["b"])

    flops = 2 * 2 * B * (d * h1 + h1 * h2 + h2 * h3 + h3 * h4 + h4 * adim)
    bytes_accessed = (sum(int(a.size) * a.dtype.itemsize for a in args)
                      + 2 * B * adim * 4)

    vmem = pl.BlockSpec(memory_space=pltpu.MemorySpace.VMEM)  # whole array, VMEM-resident
    x1, x2 = pl.pallas_call(
        _dual_tower_kernel,
        out_shape=(jax.ShapeDtypeStruct((B, adim), jnp.float32),
                   jax.ShapeDtypeStruct((B, adim), jnp.float32)),
        in_specs=[vmem] * len(args),
        out_specs=(vmem, vmem),
        cost_estimate=pl.CostEstimate(flops=int(flops), transcendentals=0,
                                      bytes_accessed=int(bytes_accessed)),
    )(*args)
    return x1, x2


def init_tower_params(key, d, action_dim):
    """Mirror weights_init_: xavier_uniform_(weight, gain=1), constant_(bias, 0)."""
    dims = [(d, 16 * d), (16 * d, 32 * d), (32 * d, 64 * d),
            (64 * d, 32 * d), (32 * d, action_dim)]
    names = ["1", "2a", "2b", "2c", "m"]
    keys = jax.random.split(key, len(dims))
    params = {}
    for k, (fi, fo), name in zip(keys, dims, names):
        bound = math.sqrt(6.0 / (fi + fo))
        params[f"w{name}"] = jax.random.uniform(
            k, (fi, fo), jnp.float32, minval=-bound, maxval=bound)
        params[f"b{name}"] = jnp.zeros((1, fo), jnp.float32)  # bias == 0 per spec
    return params


def pack_params(params1, params2):
    """Stack the two towers on a leading axis, cast weights to bf16, and pack
    all ten biases into one lane-sliceable f32 buffer."""
    names = ["1", "2a", "2b", "2c", "m"]
    packed = {}
    for n in names:
        packed[f"w{n}"] = jnp.stack(
            [params1[f"w{n}"], params2[f"w{n}"]], axis=0).astype(jnp.bfloat16)
    bias = jnp.stack(
        [jnp.concatenate([p[f"b{n}"] for n in names], axis=-1)
         for p in (params1, params2)], axis=0)
    packed["b"] = bias.astype(jnp.float32)  # (2, 1, h1+h2+h3+h4+adim)
    return packed


if __name__ == "__main__":
    # Small, module-consistent shapes (hidden_dim is unused by the layer sizing
    # in the reference PyTorch module, so it is omitted).
    num_inputs = 6
    num_preferences = 2
    action_dim = 4
    batch = 8
    d = num_inputs + num_preferences  # 8 -> hidden widths 128 / 256 / 512 / 256

    root = jax.random.PRNGKey(0)
    k_state, k_pref, k_p1, k_p2 = jax.random.split(root, 4)

    state = jax.random.normal(k_state, (batch, num_inputs), jnp.float32)
    preference = jax.random.normal(k_pref, (batch, num_preferences), jnp.float32)

    params1 = init_tower_params(k_p1, d, action_dim)
    params2 = init_tower_params(k_p2, d, action_dim)
    packed = pack_params(params1, params2)

    fwd = jax.jit(discrete_g_forward)
    x1, x2 = fwd(state, preference, packed)
    jax.block_until_ready((x1, x2))

    xu = jnp.concatenate([state, preference], axis=1)

    # Reference 1: identical bf16-weight / bf16-dot-input quantization, f32
    # accumulation -> isolates the Pallas lowering (tight tolerance).
    def ref_tower_quantized(t):
        def dot(a, w):
            return jnp.dot(a.astype(jnp.bfloat16), w,
                           preferred_element_type=jnp.float32)
        p = (params1, params2)[t]
        h = jnp.maximum(dot(xu, packed["w1"][t]) + p["b1"], 0.0)
        h = jnp.maximum(dot(h, packed["w2a"][t]) + p["b2a"], 0.0)
        h = jnp.maximum(dot(h, packed["w2b"][t]) + p["b2b"], 0.0)
        h = jnp.maximum(dot(h, packed["w2c"][t]) + p["b2c"], 0.0)
        return dot(h, packed["wm"][t]) + p["bm"]

    # Reference 2: full-f32 weights and highest-precision dots -> parity with
    # the f32 PyTorch module (loose tolerance, bounds bf16 drift).
    def ref_tower_f32(t):
        def dot(a, w):
            return jnp.dot(a, w, precision=jax.lax.Precision.HIGHEST)
        p = (params1, params2)[t]
        h = jnp.maximum(dot(xu, p["w1"]) + p["b1"], 0.0)
        h = jnp.maximum(dot(h, p["w2a"]) + p["b2a"], 0.0)
        h = jnp.maximum(dot(h, p["w2b"]) + p["b2b"], 0.0)
        h = jnp.maximum(dot(h, p["w2c"]) + p["b2c"], 0.0)
        return dot(h, p["wm"]) + p["bm"]

    for t, x in enumerate((x1, x2)):
        assert jnp.allclose(x, ref_tower_quantized(t), atol=1e-3, rtol=1e-3), t
        assert jnp.allclose(x, ref_tower_f32(t), atol=5e-2, rtol=5e-2), t

    print("KERNEL_OK")
</pallas_src>

<mosaic_0001>
module attributes {stable_mosaic.version = 11 : i64} {
  func.func @_dual_tower_kernel(%arg0: memref<8x8xf32, #tpu.memory_space<vmem>>, %arg1: memref<2x8x128xbf16, #tpu.memory_space<vmem>>, %arg2: memref<2x128x256xbf16, #tpu.memory_space<vmem>>, %arg3: memref<2x256x512xbf16, #tpu.memory_space<vmem>>, %arg4: memref<2x512x256xbf16, #tpu.memory_space<vmem>>, %arg5: memref<2x256x4xbf16, #tpu.memory_space<vmem>>, %arg6: memref<2x1x1156xf32, #tpu.memory_space<vmem>>, %arg7: memref<8x4xf32, #tpu.memory_space<vmem>>, %arg8: memref<8x4xf32, #tpu.memory_space<vmem>>) attributes {dimension_semantics = [], scalar_prefetch = 0 : i64, scratch_operands = 0 : i64, tpu.core_type = #tpu.core_type<tc>} {
    %c0 = arith.constant 0 : index
    %c0_0 = arith.constant 0 : index
    %0 = vector.load %arg0[%c0, %c0_0] : memref<8x8xf32, #tpu.memory_space<vmem>>, vector<8x8xf32>
    %c0_1 = arith.constant 0 : index
    %c0_2 = arith.constant 0 : index
    %c0_3 = arith.constant 0 : index
    %1 = vector.load %arg1[%c0_1, %c0_2, %c0_3] : memref<2x8x128xbf16, #tpu.memory_space<vmem>>, vector<1x8x128xbf16>
    %2 = vector.shape_cast %1 : vector<1x8x128xbf16> to vector<8x128xbf16>
    %3 = arith.truncf %0 : vector<8x8xf32> to vector<8x8xbf16>
    %cst = arith.constant dense<0.000000e+00> : vector<8x128xf32>
    %4 = tpu.matmul %3, %2, %cst {dimension_numbers = #tpu.dot_dimension_numbers<[1], [0], [0], [1], [0, 0, 1, 1], [], []>} : vector<8x8xbf16>, vector<8x128xbf16>, vector<8x128xf32> -> vector<8x128xf32>
    %c0_4 = arith.constant 0 : index
    %c0_5 = arith.constant 0 : index
    %c0_6 = arith.constant 0 : index
    %5 = vector.load %arg6[%c0_4, %c0_5, %c0_6] : memref<2x1x1156xf32, #tpu.memory_space<vmem>>, vector<1x1x128xf32>
    %6 = vector.shape_cast %5 : vector<1x1x128xf32> to vector<1x128xf32>
    %7 = vector.broadcast %6 : vector<1x128xf32> to vector<8x128xf32>
    %8 = arith.addf %4, %7 : vector<8x128xf32>
    %cst_7 = arith.constant 0.000000e+00 : f32
    %9 = vector.broadcast %cst_7 : f32 to vector<8x128xf32>
    %10 = arith.maximumf %8, %9 : vector<8x128xf32>
    %c0_8 = arith.constant 0 : index
    %c0_9 = arith.constant 0 : index
    %c0_10 = arith.constant 0 : index
    %11 = vector.load %arg2[%c0_8, %c0_9, %c0_10] : memref<2x128x256xbf16, #tpu.memory_space<vmem>>, vector<1x128x256xbf16>
    %12 = vector.shape_cast %11 : vector<1x128x256xbf16> to vector<128x256xbf16>
    %13 = arith.truncf %10 : vector<8x128xf32> to vector<8x128xbf16>
    %cst_11 = arith.constant dense<0.000000e+00> : vector<8x256xf32>
    %14 = tpu.matmul %13, %12, %cst_11 {dimension_numbers = #tpu.dot_dimension_numbers<[1], [0], [0], [1], [0, 0, 1, 1], [], []>} : vector<8x128xbf16>, vector<128x256xbf16>, vector<8x256xf32> -> vector<8x256xf32>
    %c0_12 = arith.constant 0 : index
    %c0_13 = arith.constant 0 : index
    %c128 = arith.constant 128 : index
    %15 = vector.load %arg6[%c0_12, %c0_13, %c128] : memref<2x1x1156xf32, #tpu.memory_space<vmem>>, vector<1x1x256xf32>
    %16 = vector.shape_cast %15 : vector<1x1x256xf32> to vector<1x256xf32>
    %17 = vector.broadcast %16 : vector<1x256xf32> to vector<8x256xf32>
    %18 = arith.addf %14, %17 : vector<8x256xf32>
    %cst_14 = arith.constant 0.000000e+00 : f32
    %19 = vector.broadcast %cst_14 : f32 to vector<8x256xf32>
    %20 = arith.maximumf %18, %19 : vector<8x256xf32>
    %c0_15 = arith.constant 0 : index
    %c0_16 = arith.constant 0 : index
    %c0_17 = arith.constant 0 : index
    %21 = vector.load %arg3[%c0_15, %c0_16, %c0_17] : memref<2x256x512xbf16, #tpu.memory_space<vmem>>, vector<1x256x512xbf16>
    %22 = vector.shape_cast %21 : vector<1x256x512xbf16> to vector<256x512xbf16>
    %23 = arith.truncf %20 : vector<8x256xf32> to vector<8x256xbf16>
    %cst_18 = arith.constant dense<0.000000e+00> : vector<8x512xf32>
    %24 = tpu.matmul %23, %22, %cst_18 {dimension_numbers = #tpu.dot_dimension_numbers<[1], [0], [0], [1], [0, 0, 1, 1], [], []>} : vector<8x256xbf16>, vector<256x512xbf16>, vector<8x512xf32> -> vector<8x512xf32>
    %c0_19 = arith.constant 0 : index
    %c0_20 = arith.constant 0 : index
    %c384 = arith.constant 384 : index
    %25 = vector.load %arg6[%c0_19, %c0_20, %c384] : memref<2x1x1156xf32, #tpu.memory_space<vmem>>, vector<1x1x512xf32>
    %26 = vector.shape_cast %25 : vector<1x1x512xf32> to vector<1x512xf32>
    %27 = vector.broadcast %26 : vector<1x512xf32> to vector<8x512xf32>
    %28 = arith.addf %24, %27 : vector<8x512xf32>
    %cst_21 = arith.constant 0.000000e+00 : f32
    %29 = vector.broadcast %cst_21 : f32 to vector<8x512xf32>
    %30 = arith.maximumf %28, %29 : vector<8x512xf32>
    %c0_22 = arith.constant 0 : index
    %c0_23 = arith.constant 0 : index
    %c0_24 = arith.constant 0 : index
    %31 = vector.load %arg4[%c0_22, %c0_23, %c0_24] : memref<2x512x256xbf16, #tpu.memory_space<vmem>>, vector<1x512x256xbf16>
    %32 = vector.shape_cast %31 : vector<1x512x256xbf16> to vector<512x256xbf16>
    %33 = arith.truncf %30 : vector<8x512xf32> to vector<8x512xbf16>
    %cst_25 = arith.constant dense<0.000000e+00> : vector<8x256xf32>
    %34 = tpu.matmul %33, %32, %cst_25 {dimension_numbers = #tpu.dot_dimension_numbers<[1], [0], [0], [1], [0, 0, 1, 1], [], []>} : vector<8x512xbf16>, vector<512x256xbf16>, vector<8x256xf32> -> vector<8x256xf32>
    %c0_26 = arith.constant 0 : index
    %c0_27 = arith.constant 0 : index
    %c896 = arith.constant 896 : index
    %35 = vector.load %arg6[%c0_26, %c0_27, %c896] : memref<2x1x1156xf32, #tpu.memory_space<vmem>>, vector<1x1x256xf32>
    %36 = vector.shape_cast %35 : vector<1x1x256xf32> to vector<1x256xf32>
    %37 = vector.broadcast %36 : vector<1x256xf32> to vector<8x256xf32>
    %38 = arith.addf %34, %37 : vector<8x256xf32>
    %cst_28 = arith.constant 0.000000e+00 : f32
    %39 = vector.broadcast %cst_28 : f32 to vector<8x256xf32>
    %40 = arith.maximumf %38, %39 : vector<8x256xf32>
    %c0_29 = arith.constant 0 : index
    %c0_30 = arith.constant 0 : index
    %c0_31 = arith.constant 0 : index
    %41 = vector.load %arg5[%c0_29, %c0_30, %c0_31] : memref<2x256x4xbf16, #tpu.memory_space<vmem>>, vector<1x256x4xbf16>
    %42 = vector.shape_cast %41 : vector<1x256x4xbf16> to vector<256x4xbf16>
    %43 = arith.truncf %40 : vector<8x256xf32> to vector<8x256xbf16>
    %cst_32 = arith.constant dense<0.000000e+00> : vector<8x4xf32>
    %44 = tpu.matmul %43, %42, %cst_32 {dimension_numbers = #tpu.dot_dimension_numbers<[1], [0], [0], [1], [0, 0, 1, 1], [], []>} : vector<8x256xbf16>, vector<256x4xbf16>, vector<8x4xf32> -> vector<8x4xf32>
    %c0_33 = arith.constant 0 : index
    %c0_34 = arith.constant 0 : index
    %c1152 = arith.constant 1152 : index
    %45 = vector.load %arg6[%c0_33, %c0_34, %c1152] : memref<2x1x1156xf32, #tpu.memory_space<vmem>>, vector<1x1x4xf32>
    %46 = vector.shape_cast %45 : vector<1x1x4xf32> to vector<1x4xf32>
    %47 = vector.broadcast %46 : vector<1x4xf32> to vector<8x4xf32>
    %48 = arith.addf %44, %47 : vector<8x4xf32>
    %c0_35 = arith.constant 0 : index
    %c0_36 = arith.constant 0 : index
    %49 = vector.load %arg7[%c0_35, %c0_36] : memref<8x4xf32, #tpu.memory_space<vmem>>, vector<8x4xf32>
    tpu.vector_store %arg7[%c0_35, %c0_36], %48 {strides = array<i32>} : memref<8x4xf32, #tpu.memory_space<vmem>>, vector<8x4xf32>,
    %c1 = arith.constant 1 : index
    %c0_37 = arith.constant 0 : index
    %c0_38 = arith.constant 0 : index
    %50 = vector.load %arg1[%c1, %c0_37, %c0_38] : memref<2x8x128xbf16, #tpu.memory_space<vmem>>, vector<1x8x128xbf16>
    %51 = vector.shape_cast %50 : vector<1x8x128xbf16> to vector<8x128xbf16>
    %52 = arith.truncf %0 : vector<8x8xf32> to vector<8x8xbf16>
    %cst_39 = arith.constant dense<0.000000e+00> : vector<8x128xf32>
    %53 = tpu.matmul %52, %51, %cst_39 {dimension_numbers = #tpu.dot_dimension_numbers<[1], [0], [0], [1], [0, 0, 1, 1], [], []>} : vector<8x8xbf16>, vector<8x128xbf16>, vector<8x128xf32> -> vector<8x128xf32>
    %c1_40 = arith.constant 1 : index
    %c0_41 = arith.constant 0 : index
    %c0_42 = arith.constant 0 : index
    %54 = vector.load %arg6[%c1_40, %c0_41, %c0_42] : memref<2x1x1156xf32, #tpu.memory_space<vmem>>, vector<1x1x128xf32>
    %55 = vector.shape_cast %54 : vector<1x1x128xf32> to vector<1x128xf32>
    %56 = vector.broadcast %55 : vector<1x128xf32> to vector<8x128xf32>
    %57 = arith.addf %53, %56 : vector<8x128xf32>
    %cst_43 = arith.constant 0.000000e+00 : f32
    %58 = vector.broadcast %cst_43 : f32 to vector<8x128xf32>
    %59 = arith.maximumf %57, %58 : vector<8x128xf32>
    %c1_44 = arith.constant 1 : index
    %c0_45 = arith.constant 0 : index
    %c0_46 = arith.constant 0 : index
    %60 = vector.load %arg2[%c1_44, %c0_45, %c0_46] : memref<2x128x256xbf16, #tpu.memory_space<vmem>>, vector<1x128x256xbf16>
    %61 = vector.shape_cast %60 : vector<1x128x256xbf16> to vector<128x256xbf16>
    %62 = arith.truncf %59 : vector<8x128xf32> to vector<8x128xbf16>
    %cst_47 = arith.constant dense<0.000000e+00> : vector<8x256xf32>
    %63 = tpu.matmul %62, %61, %cst_47 {dimension_numbers = #tpu.dot_dimension_numbers<[1], [0], [0], [1], [0, 0, 1, 1], [], []>} : vector<8x128xbf16>, vector<128x256xbf16>, vector<8x256xf32> -> vector<8x256xf32>
    %c1_48 = arith.constant 1 : index
    %c0_49 = arith.constant 0 : index
    %c128_50 = arith.constant 128 : index
    %64 = vector.load %arg6[%c1_48, %c0_49, %c128_50] : memref<2x1x1156xf32, #tpu.memory_space<vmem>>, vector<1x1x256xf32>
    %65 = vector.shape_cast %64 : vector<1x1x256xf32> to vector<1x256xf32>
    %66 = vector.broadcast %65 : vector<1x256xf32> to vector<8x256xf32>
    %67 = arith.addf %63, %66 : vector<8x256xf32>
    %cst_51 = arith.constant 0.000000e+00 : f32
    %68 = vector.broadcast %cst_51 : f32 to vector<8x256xf32>
    %69 = arith.maximumf %67, %68 : vector<8x256xf32>
    %c1_52 = arith.constant 1 : index
    %c0_53 = arith.constant 0 : index
    %c0_54 = arith.constant 0 : index
    %70 = vector.load %arg3[%c1_52, %c0_53, %c0_54] : memref<2x256x512xbf16, #tpu.memory_space<vmem>>, vector<1x256x512xbf16>
    %71 = vector.shape_cast %70 : vector<1x256x512xbf16> to vector<256x512xbf16>
    %72 = arith.truncf %69 : vector<8x256xf32> to vector<8x256xbf16>
    %cst_55 = arith.constant dense<0.000000e+00> : vector<8x512xf32>
    %73 = tpu.matmul %72, %71, %cst_55 {dimension_numbers = #tpu.dot_dimension_numbers<[1], [0], [0], [1], [0, 0, 1, 1], [], []>} : vector<8x256xbf16>, vector<256x512xbf16>, vector<8x512xf32> -> vector<8x512xf32>
    %c1_56 = arith.constant 1 : index
    %c0_57 = arith.constant 0 : index
    %c384_58 = arith.constant 384 : index
    %74 = vector.load %arg6[%c1_56, %c0_57, %c384_58] : memref<2x1x1156xf32, #tpu.memory_space<vmem>>, vector<1x1x512xf32>
    %75 = vector.shape_cast %74 : vector<1x1x512xf32> to vector<1x512xf32>
    %76 = vector.broadcast %75 : vector<1x512xf32> to vector<8x512xf32>
    %77 = arith.addf %73, %76 : vector<8x512xf32>
    %cst_59 = arith.constant 0.000000e+00 : f32
    %78 = vector.broadcast %cst_59 : f32 to vector<8x512xf32>
    %79 = arith.maximumf %77, %78 : vector<8x512xf32>
    %c1_60 = arith.constant 1 : index
    %c0_61 = arith.constant 0 : index
    %c0_62 = arith.constant 0 : index
    %80 = vector.load %arg4[%c1_60, %c0_61, %c0_62] : memref<2x512x256xbf16, #tpu.memory_space<vmem>>, vector<1x512x256xbf16>
    %81 = vector.shape_cast %80 : vector<1x512x256xbf16> to vector<512x256xbf16>
    %82 = arith.truncf %79 : vector<8x512xf32> to vector<8x512xbf16>
    %cst_63 = arith.constant dense<0.000000e+00> : vector<8x256xf32>
    %83 = tpu.matmul %82, %81, %cst_63 {dimension_numbers = #tpu.dot_dimension_numbers<[1], [0], [0], [1], [0, 0, 1, 1], [], []>} : vector<8x512xbf16>, vector<512x256xbf16>, vector<8x256xf32> -> vector<8x256xf32>
    %c1_64 = arith.constant 1 : index
    %c0_65 = arith.constant 0 : index
    %c896_66 = arith.constant 896 : index
    %84 = vector.load %arg6[%c1_64, %c0_65, %c896_66] : memref<2x1x1156xf32, #tpu.memory_space<vmem>>, vector<1x1x256xf32>
    %85 = vector.shape_cast %84 : vector<1x1x256xf32> to vector<1x256xf32>
    %86 = vector.broadcast %85 : vector<1x256xf32> to vector<8x256xf32>
    %87 = arith.addf %83, %86 : vector<8x256xf32>
    %cst_67 = arith.constant 0.000000e+00 : f32
    %88 = vector.broadcast %cst_67 : f32 to vector<8x256xf32>
    %89 = arith.maximumf %87, %88 : vector<8x256xf32>
    %c1_68 = arith.constant 1 : index
    %c0_69 = arith.constant 0 : index
    %c0_70 = arith.constant 0 : index
    %90 = vector.load %arg5[%c1_68, %c0_69, %c0_70] : memref<2x256x4xbf16, #tpu.memory_space<vmem>>, vector<1x256x4xbf16>
    %91 = vector.shape_cast %90 : vector<1x256x4xbf16> to vector<256x4xbf16>
    %92 = arith.truncf %89 : vector<8x256xf32> to vector<8x256xbf16>
    %cst_71 = arith.constant dense<0.000000e+00> : vector<8x4xf32>
    %93 = tpu.matmul %92, %91, %cst_71 {dimension_numbers = #tpu.dot_dimension_numbers<[1], [0], [0], [1], [0, 0, 1, 1], [], []>} : vector<8x256xbf16>, vector<256x4xbf16>, vector<8x4xf32> -> vector<8x4xf32>
    %c1_72 = arith.constant 1 : index
    %c0_73 = arith.constant 0 : index
    %c1152_74 = arith.constant 1152 : index
    %94 = vector.load %arg6[%c1_72, %c0_73, %c1152_74] : memref<2x1x1156xf32, #tpu.memory_space<vmem>>, vector<1x1x4xf32>
    %95 = vector.shape_cast %94 : vector<1x1x4xf32> to vector<1x4xf32>
    %96 = vector.broadcast %95 : vector<1x4xf32> to vector<8x4xf32>
    %97 = arith.addf %93, %96 : vector<8x4xf32>
    %c0_75 = arith.constant 0 : index
    %c0_76 = arith.constant 0 : index
    %98 = vector.load %arg8[%c0_75, %c0_76] : memref<8x4xf32, #tpu.memory_space<vmem>>, vector<8x4xf32>
    tpu.vector_store %arg8[%c0_75, %c0_76], %97 {strides = array<i32>} : memref<8x4xf32, #tpu.memory_space<vmem>>, vector<8x4xf32>,
    return
  }
}

</mosaic_0001>

<bundles_post_ra>
// kernel: discrete_g_forward.1
= control target key start
LH: loop header
LB: loop body
LE: loop exit
PB: predicated region body
PF: predicated region fallthrough
CT: control target
= control target key end

     0   :  { %14 = vsyncpa [#allocation3], 0  ;;  %s4103_s0 = inlined_call_operand.vmem [shape: f32[8,8], index: 0, kind: input, shape index: {}]   ;;  %s4104_s1 = inlined_call_operand.vmem [shape: bf16[2,8,128], index: 1, kind: input, shape index: {}]   ;;  %s4105_s2 = inlined_call_operand.vmem [shape: bf16[2,128,256], index: 2, kind: input, shape index: {}]   ;;  %s4106_s3 = inlined_call_operand.hbm [shape: bf16[2,256,512], index: 3, kind: input, shape index: {}]   ;;  %s4107_s4 = inlined_call_operand.hbm [shape: bf16[2,512,256], index: 4, kind: input, shape index: {}]   ;;  %s4108_s5 = inlined_call_operand.vmem [shape: bf16[2,256,4], index: 5, kind: input, shape index: {}]   ;;  %s4109_s6 = inlined_call_operand.vmem [shape: f32[2,1,1156], index: 6, kind: input, shape index: {}]   ;;  %s4110_s7 = inlined_call_operand.vmem [shape: f32[8,4], index: 7, kind: output, shape index: {0}]   ;;  %s4111_s8 = inlined_call_operand.vmem [shape: f32[8,4], index: 8, kind: output, shape index: {1}]  }
   0x1   :  { %15 = vsyncpa [#allocation5], 0  ;;  %s3758_s27 = smov [#allocation2]  }
   0x2   :  { %s27_s28 = sshll.u32 %s3758_s27, 4  ;;  %s28_s28 = int_to_ptr.vmem [resolvable:$true] %s27_s28 }
   0x3   :  { %s3722_s29 = scalar_lea.vmem %s28_s28, 16384  ;;  %p3727_p1 = scmp.lt.s32.totalorder %s28_s28, %s28_s28 }
   0x4   :  { %p3723_p0 = scmp.ne.s32.totalorder %s28_s28, %s3722_s29  ;;  %p3728_p2 = scmp.lt.s32.totalorder %s3722_s29, %s3722_s29 }
   0x6   :  { %p3729_p3 = por %p3728_p2, %p3727_p1 }
   0x8   :  { %p3730_p4 = pnand %p3729_p3, %p3723_p0 }
   0xa   :  { %3733 = shalt.err (!%p3730_p4)
}
   0xb   :  { %s3759_s30 = smov 256   ;;  %s3760_s9 = smov 16  }
   0xc   :  { %33 = dma.hbm_to_vmem [thread:$0]  %s4106_s3, 16384, %s28_s28, [#allocation3], %s3759_s30, %s3759_s30, %s3760_s9  }
   0xd   :  { %s3761_s12 = smov [#allocation4]  }
   0xe   :  { %s39_s13 = sshll.u32 %s3761_s12, 4  ;;  %s40_s13 = int_to_ptr.vmem [resolvable:$true] %s39_s13 }
   0xf   :  { %s3742_s14 = scalar_lea.vmem %s40_s13, 16384  ;;  %p3747_p6 = scmp.lt.s32.totalorder %s40_s13, %s40_s13 }
  0x10   :  { %p3743_p5 = scmp.ne.s32.totalorder %s40_s13, %s3742_s14  ;;  %p3748_p7 = scmp.lt.s32.totalorder %s3742_s14, %s3742_s14 }
  0x12   :  { %p3749_p8 = por %p3748_p7, %p3747_p6 }
  0x14   :  { %p3750_p9 = pnand %p3749_p8, %p3743_p5 }
  0x16   :  { %3753 = shalt.err (!%p3750_p9)
}
  0x17   :  { %s3762_s15 = smov 128   ;;  %s3763_s16 = smov 8  }
  0x18   :  { %45 = dma.hbm_to_vmem [thread:$0]  %s4107_s4, 16384, %s40_s13, [#allocation5], %s3762_s15, %s3762_s15, %s3763_s16  }
  0x19   :  { %3754 = dma.done.wait [#allocation3], 16384  }
  0x1a   :  { %3755 = vsyncadd [#allocation3], 4294950912 }
  0x1b   :  { %3756 = dma.done.wait [#allocation5], 16384  }
  0x1c   :  { %3757 = vsyncadd [#allocation5], 4294950912  ;;  %v3764_v0 = vmov 0.0   ;;  %vm3765_vm0 = vmmov 0   ;;  %vm71_vm1 = vcmask 1043456   ;;  %v57_v2 = vld [vmem:[%s4103_s0] sm:$0xff] }
  0x1d   :  { %3229 = vmatprep.subr.bf16.mxu0 %v3764_v0  ;;  %3231 = vmatprep.mubr.msk.bf16.mxu0 %vm3765_vm0, %v3764_v0  ;;  %v58_v1 = vld [vmem:[%s4104_s1] sm:$0xf]  ;;  %v3828_v4 = vpack.c.bf16 %v57_v2, %v57_v2  ;;  %v3250_v5 = vld [vmem:[%s4105_s2 + $0x74] ss:$8 sps:$4 sm:$0xff]   ;;  %vm67_vm2 = vcmask 64512   ;;  %v3766_v21 = vmov 0  }
  0x1e   :  { %v73_v3 = vsel %vm71_vm1, %v58_v1, 0  ;;  %v3252_v6 = vld [vmem:[%s4105_s2 + $0x70] ss:$8 sps:$4 sm:$0xff]   ;;  %225 = vmatprep.subr.bf16.mxu1 %v3250_v5  ;;  %v3253_v7 = vld [vmem:[%s4105_s2 + $0x64] ss:$8 sps:$4 sm:$0xff]   ;;  %257 = vmatprep.mubr.bf16.mxu1 %v3766_v21  ;;  %vm1423_vm3 = vcmask 31744  }
  0x1f   :  { %3230 = vmatpush3.bf16.msra.mxu0 %v73_v3  ;;  %226 = vmatpush1.bf16.msra.mxu1 %v3252_v6  ;;  %v3255_v8 = vld [vmem:[%s4105_s2 + $0x60] ss:$8 sps:$4 sm:$0xff]   ;;  %v3256_v9 = vld [vmem:[%s4105_s2 + $0x54] ss:$8 sps:$4 sm:$0xff]   ;;  %v3258_v10 = vld [vmem:[%s4105_s2 + $0x50] ss:$8 sps:$4 sm:$0xff]  }
  0x20   :  { %227 = vmatprep.subr.bf16.mxu1 %v3253_v7  ;;  %v3259_v11 = vld [vmem:[%s4105_s2 + $0x44] ss:$8 sps:$4 sm:$0xff]   ;;  %v3261_v12 = vld [vmem:[%s4105_s2 + $0x40] ss:$8 sps:$4 sm:$0xff]   ;;  %v3262_v13 = vld [vmem:[%s4105_s2 + $0x34] ss:$8 sps:$4 sm:$0xff]  }
  0x21   :  { %v3264_v14 = vld [vmem:[%s4105_s2 + $0x30] ss:$8 sps:$4 sm:$0xff]   ;;  %v3265_v15 = vld [vmem:[%s4105_s2 + $0x24] ss:$8 sps:$4 sm:$0xff]   ;;  %v3267_v16 = vld [vmem:[%s4105_s2 + $0x20] ss:$8 sps:$4 sm:$0xff]  }
  0x22   :  { %3232 = vmatmul.mubr.msk.bf16.vlgmr.msra.gmra.mxu0 %vm67_vm2, %v3828_v4  ;;  %v3268_v17 = vld [vmem:[%s4105_s2 + $0x14] ss:$8 sps:$4 sm:$0xff]   ;;  %v3270_v18 = vld [vmem:[%s4105_s2 + $0x10] ss:$8 sps:$4 sm:$0xff]   ;;  %v3271_v19 = vld [vmem:[%s4105_s2 + $0x4] ss:$8 sps:$4 sm:$0xff]  }
  0x23   :  { %228 = vmatpush1.bf16.msra.mxu1 %v3255_v8  ;;  %v3273_v20 = vld [vmem:[%s4105_s2] ss:$8 sps:$4 sm:$0xff]   ;;  %v3276_v23 = vld [vmem:[#allocation2 + $0xe4] ss:$16 sps:$4 sm:$0xff]   ;;  %v3279_v24 = vld [vmem:[#allocation2 + $0xec] ss:$16 sps:$4 sm:$0xff]  }
  0x24   :  { %229 = vmatprep.subr.bf16.mxu1 %v3256_v9  ;;  %v3274_v22 = vld [vmem:[#allocation2 + $0xe0] ss:$16 sps:$4 sm:$0xff]   ;;  %v3282_v25 = vld [vmem:[#allocation2 + $0xc4] ss:$16 sps:$4 sm:$0xff]   ;;  %676 = vmatprep.subr.bf16.mxu0 %v3276_v23  ;;  %v3277_v57 = vld [vmem:[#allocation2 + $0xe8] ss:$16 sps:$4 sm:$0xff]  }
  0x25   :  { %v3280_v26 = vld [vmem:[#allocation2 + $0xc0] ss:$16 sps:$4 sm:$0xff]   ;;  %677 = vmatpush1.bf16.msra.mxu0 %v3274_v22  ;;  %v3288_v27 = vld [vmem:[#allocation2 + $0xa4] ss:$16 sps:$4 sm:$0xff]   ;;  %v3285_v59 = vld [vmem:[#allocation2 + $0xcc] ss:$16 sps:$4 sm:$0xff]  }
  0x26   :  { %678 = vmatprep.subr.bf16.mxu0 %v3282_v25  ;;  %v3286_v28 = vld [vmem:[#allocation2 + $0xa0] ss:$16 sps:$4 sm:$0xff]   ;;  %v3294_v29 = vld [vmem:[#allocation2 + $0x84] ss:$16 sps:$4 sm:$0xff]   ;;  %v3283_v61 = vld [vmem:[#allocation2 + $0xc8] ss:$16 sps:$4 sm:$0xff]  }
  0x27   :  { %230 = vmatpush1.bf16.msra.mxu1 %v3258_v10  ;;  %v3292_v30 = vld [vmem:[#allocation2 + $0x80] ss:$16 sps:$4 sm:$0xff]   ;;  %v3300_v31 = vld [vmem:[#allocation2 + $0x64] ss:$16 sps:$4 sm:$0xff]   ;;  %v3291_v62 = vld [vmem:[#allocation2 + $0xac] ss:$16 sps:$4 sm:$0xff]  }
  0x28   :  { %231 = vmatprep.subr.bf16.mxu1 %v3259_v11  ;;  %v3298_v32 = vld [vmem:[#allocation2 + $0x60] ss:$16 sps:$4 sm:$0xff]   ;;  %v3306_v33 = vld [vmem:[#allocation2 + $0x44] ss:$16 sps:$4 sm:$0xff]   ;;  %v3289_v63 = vld [vmem:[#allocation2 + $0xa8] ss:$16 sps:$4 sm:$0xff]  }
  0x29   :  { %679 = vmatpush1.bf16.msra.mxu0 %v3280_v26  ;;  %v3304_v34 = vld [vmem:[#allocation2 + $0x40] ss:$16 sps:$4 sm:$0xff]   ;;  %v3312_v35 = vld [vmem:[#allocation2 + $0x24] ss:$16 sps:$4 sm:$0xff]   ;;  %v3297_v1 = vld [vmem:[#allocation2 + $0x8c] ss:$16 sps:$4 sm:$0xff]  }
  0x2a   :  { %680 = vmatprep.subr.bf16.mxu0 %v3288_v27  ;;  %v3310_v36 = vld [vmem:[#allocation2 + $0x20] ss:$16 sps:$4 sm:$0xff]   ;;  %v3318_v37 = vld [vmem:[#allocation2 + $0x4] ss:$16 sps:$4 sm:$0xff]   ;;  %v3295_v2 = vld [vmem:[#allocation2 + $0x88] ss:$16 sps:$4 sm:$0xff]  }
  0x2b   :  { %232 = vmatpush1.bf16.msra.mxu1 %v3261_v12  ;;  %v3316_v38 = vld [vmem:[#allocation2] ss:$16 sps:$4 sm:$0xff]   ;;  %v3324_v39 = vld [vmem:[#allocation2 + $0x1e4] ss:$16 sps:$4 sm:$0xff]   ;;  %v3303_v3 = vld [vmem:[#allocation2 + $0x6c] ss:$16 sps:$4 sm:$0xff]  }
  0x2c   :  { %233 = vmatprep.subr.bf16.mxu1 %v3262_v13  ;;  %v3322_v40 = vld [vmem:[#allocation2 + $0x1e0] ss:$16 sps:$4 sm:$0xff]   ;;  %v3330_v41 = vld [vmem:[#allocation2 + $0x1c4] ss:$16 sps:$4 sm:$0xff]   ;;  %v3301_v5 = vld [vmem:[#allocation2 + $0x68] ss:$16 sps:$4 sm:$0xff]  }
  0x2d   :  { %681 = vmatpush1.bf16.msra.mxu0 %v3286_v28  ;;  %v3328_v42 = vld [vmem:[#allocation2 + $0x1c0] ss:$16 sps:$4 sm:$0xff]   ;;  %v3336_v43 = vld [vmem:[#allocation2 + $0x1a4] ss:$16 sps:$4 sm:$0xff]   ;;  %v3309_v6 = vld [vmem:[#allocation2 + $0x4c] ss:$16 sps:$4 sm:$0xff]  }
  0x2e   :  { %682 = vmatprep.subr.bf16.mxu0 %v3294_v29  ;;  %v3334_v44 = vld [vmem:[#allocation2 + $0x1a0] ss:$16 sps:$4 sm:$0xff]   ;;  %v3342_v45 = vld [vmem:[#allocation2 + $0x184] ss:$16 sps:$4 sm:$0xff]   ;;  %v3307_v7 = vld [vmem:[#allocation2 + $0x48] ss:$16 sps:$4 sm:$0xff]  }
  0x2f   :  { %234 = vmatpush1.bf16.msra.mxu1 %v3264_v14  ;;  %v3340_v46 = vld [vmem:[#allocation2 + $0x180] ss:$16 sps:$4 sm:$0xff]   ;;  %v3348_v47 = vld [vmem:[#allocation2 + $0x164] ss:$16 sps:$4 sm:$0xff]   ;;  %v3315_v8 = vld [vmem:[#allocation2 + $0x2c] ss:$16 sps:$4 sm:$0xff]  }
  0x30   :  { %235 = vmatprep.subr.bf16.mxu1 %v3265_v15  ;;  %v3346_v48 = vld [vmem:[#allocation2 + $0x160] ss:$16 sps:$4 sm:$0xff]   ;;  %v3354_v49 = vld [vmem:[#allocation2 + $0x144] ss:$16 sps:$4 sm:$0xff]   ;;  %v3313_v9 = vld [vmem:[#allocation2 + $0x28] ss:$16 sps:$4 sm:$0xff]  }
  0x31   :  { %683 = vmatpush1.bf16.msra.mxu0 %v3292_v30  ;;  %v3352_v50 = vld [vmem:[#allocation2 + $0x140] ss:$16 sps:$4 sm:$0xff]   ;;  %v3321_v10 = vld [vmem:[#allocation2 + $0xc] ss:$16 sps:$4 sm:$0xff]   ;;  %v3319_v11 = vld [vmem:[#allocation2 + $0x8] ss:$16 sps:$4 sm:$0xff]  }
  0x32   :  { %684 = vmatprep.subr.bf16.mxu0 %v3300_v31  ;;  %v2801_v51 = vld [vmem:[%s4109_s6] ss:$0 sm:$0xff]  ;;  %v3327_v12 = vld [vmem:[#allocation2 + $0x1ec] ss:$16 sps:$4 sm:$0xff]   ;;  %v3325_v13 = vld [vmem:[#allocation2 + $0x1e8] ss:$16 sps:$4 sm:$0xff]  }
  0x33   :  { %236 = vmatpush1.bf16.msra.mxu1 %v3267_v16  ;;  %v3333_v14 = vld [vmem:[#allocation2 + $0x1cc] ss:$16 sps:$4 sm:$0xff]   ;;  %v3331_v15 = vld [vmem:[#allocation2 + $0x1c8] ss:$16 sps:$4 sm:$0xff]   ;;  %v3360_v25 = vld [vmem:[#allocation2 + $0x124] ss:$16 sps:$4 sm:$0xff]  }
  0x34   :  { %237 = vmatprep.subr.bf16.mxu1 %v3268_v17  ;;  %v3339_v16 = vld [vmem:[#allocation2 + $0x1ac] ss:$16 sps:$4 sm:$0xff]   ;;  %v3337_v17 = vld [vmem:[#allocation2 + $0x1a8] ss:$16 sps:$4 sm:$0xff]   ;;  %v3358_v27 = vld [vmem:[#allocation2 + $0x120] ss:$16 sps:$4 sm:$0xff]  }
  0x35   :  { %685 = vmatpush1.bf16.msra.mxu0 %v3298_v32  ;;  %v3349_v22 = vld [vmem:[#allocation2 + $0x168] ss:$16 sps:$4 sm:$0xff]   ;;  %v3357_v23 = vld [vmem:[#allocation2 + $0x14c] ss:$16 sps:$4 sm:$0xff]   ;;  %v3366_v29 = vld [vmem:[#allocation2 + $0x104] ss:$16 sps:$4 sm:$0xff]  }
  0x36   :  { %686 = vmatprep.subr.bf16.mxu0 %v3306_v33  ;;  %v3363_v26 = vld [vmem:[#allocation2 + $0x12c] ss:$16 sps:$4 sm:$0xff]   ;;  %v3361_v28 = vld [vmem:[#allocation2 + $0x128] ss:$16 sps:$4 sm:$0xff]   ;;  %v3364_v31 = vld [vmem:[#allocation2 + $0x100] ss:$16 sps:$4 sm:$0xff]  }
  0x37   :  { %238 = vmatpush1.bf16.msra.mxu1 %v3270_v18  ;;  %v3345_v18 = vld [vmem:[#allocation2 + $0x18c] ss:$16 sps:$4 sm:$0xff]   ;;  %v3367_v32 = vld [vmem:[#allocation2 + $0x108] ss:$16 sps:$4 sm:$0xff]  }
  0x38   :  { %239 = vmatprep.subr.bf16.mxu1 %v3271_v19  ;;  %v3343_v19 = vld [vmem:[#allocation2 + $0x188] ss:$16 sps:$4 sm:$0xff]   ;;  %v3369_v30 = vld [vmem:[#allocation2 + $0x10c] ss:$16 sps:$4 sm:$0xff]  }
  0x39   :  { %687 = vmatpush1.bf16.msra.mxu0 %v3304_v34  ;;  %v3372_v33 = vld [vmem:[#allocation4 + $0x74] ss:$8 sps:$4 sm:$0xff]  }
  0x3a   :  { %688 = vmatprep.subr.bf16.mxu0 %v3312_v35  ;;  %v3375_v34 = vld [vmem:[#allocation4 + $0x174] ss:$8 sps:$4 sm:$0xff]   ;;  %v135_v35 = vlaneseq }
  0x3b   :  { %240 = vmatpush1.bf16.msra.mxu1 %v3273_v20  ;;  %v3351_v20 = vld [vmem:[#allocation2 + $0x16c] ss:$16 sps:$4 sm:$0xff]  }
  0x3c   :  { %717 = vmatprep.subr.bf16.mxu1 %v3279_v24  ;;  %v3355_v24 = vld [vmem:[#allocation2 + $0x148] ss:$16 sps:$4 sm:$0xff]  }
  0x3d   :  { %689 = vmatpush1.bf16.msra.mxu0 %v3310_v36  ;;  %v3884_v36 = vshrl.u32 %v135_v35, 7  ;;  %v3436_v35 = vld [vmem:[#allocation4 + $0xc0] ss:$8 sps:$4 sm:$0xff]  }
  0x3e   :  { %690 = vmatprep.subr.bf16.mxu0 %v3318_v37 }
  0x3f   :  { %v3887_v37 = vsub.s32 0, %v3884_v36 }
  0x41   :  { %691 = vmatpush1.bf16.msra.mxu0 %v3316_v38  ;;  %v133_v38 = vld [vmem:[%s4109_s6 + $0x1] sm:$0x3] }
  0x42   :  { %692 = vmatprep.subr.bf16.mxu0 %v3324_v39  ;;  %v3893_v39 = vsub.s32 1, %v3884_v36 }
  0x45   :  { %693 = vmatpush2.bf16.msra.mxu0 %v3322_v40  ;;  %v138_v40 = vrot.slane %v133_v38, %v3887_v37 }
  0x46   :  { %694 = vmatprep.subr.bf16.mxu0 %v3330_v41  ;;  %v142_v41 = vrot.slane %v133_v38, %v3893_v39  ;;  %v3439_v38 = vld [vmem:[#allocation4 + $0x1c0] ss:$8 sps:$4 sm:$0xff]  }
  0x49   :  { %695 = vmatpush2.bf16.msra.mxu0 %v3328_v42 }
  0x4a   :  { %696 = vmatprep.subr.bf16.mxu0 %v3336_v43 }
  0x4d   :  { %697 = vmatpush2.bf16.msra.mxu0 %v3334_v44 }
  0x4e   :  { %698 = vmatprep.subr.bf16.mxu0 %v3342_v45 }
  0x51   :  { %699 = vmatpush2.bf16.msra.mxu0 %v3340_v46 }
  0x52   :  { %700 = vmatprep.subr.bf16.mxu0 %v3348_v47 }
  0x55   :  { %701 = vmatpush2.bf16.msra.mxu0 %v3346_v48 }
  0x56   :  { %702 = vmatprep.subr.bf16.mxu0 %v3354_v49 }
  0x59   :  { %703 = vmatpush2.bf16.msra.mxu0 %v3352_v50 }
  0x5a   :  { %704 = vmatprep.subr.bf16.mxu0 %v3360_v25  ;;  %v3426_v25 = vld [vmem:[#allocation4 + $0xe4] ss:$8 sps:$4 sm:$0xff]  }
  0x5d   :  { %705 = vmatpush2.bf16.msra.mxu0 %v3358_v27  ;;  %v3424_v27 = vld [vmem:[#allocation4 + $0xe0] ss:$8 sps:$4 sm:$0xff]  }
  0x5e   :  { %706 = vmatprep.subr.bf16.mxu0 %v3366_v29  ;;  %v3432_v29 = vld [vmem:[#allocation4 + $0xd4] ss:$8 sps:$4 sm:$0xff]  }
  0x61   :  { %707 = vmatpush2.bf16.msra.mxu0 %v3364_v31  ;;  %v3430_v31 = vld [vmem:[#allocation4 + $0xd0] ss:$8 sps:$4 sm:$0xff]  }
  0x62   :  { %1162 = vmatprep.subr.bf16.mxu0 %v3372_v33  ;;  %v3438_v33 = vld [vmem:[#allocation4 + $0xc4] ss:$8 sps:$4 sm:$0xff]  }
  0xe2   :  { %v109_v52 = vpop.f32.mrf.mxu0 }
  0xe3   :  { %v110_v53 = vadd.f32 %v2801_v51, %v109_v52  ;;  %v3370_v51 = vld [vmem:[#allocation4 + $0x70] ss:$8 sps:$4 sm:$0xff]  }
  0xe4   :  { %v3233_v54 = vpop.f32.mrf.mxu0  ;;  %v3373_v52 = vld [vmem:[#allocation4 + $0x170] ss:$8 sps:$4 sm:$0xff]  }
  0xe5   :  { %v115_v55 = vmax.f32 %v110_v53, 0.0  ;;  %v3378_v54 = vld [vmem:[#allocation4 + $0x64] ss:$8 sps:$4 sm:$0xff]  }
  0xe6   :  { %v112_v56 = vpop.f32.mrf.mxu0 }
  0xe7   :  { %v132_v58 = vpack.c.bf16 %v115_v55, %v115_v55  ;;  %v3381_v55 = vld [vmem:[#allocation4 + $0x164] ss:$8 sps:$4 sm:$0xff]   ;;  %v3376_v56 = vld [vmem:[#allocation4 + $0x60] ss:$8 sps:$4 sm:$0xff]  }
  0xe8   :  { %v3234_v60 = vpop.f32.mrf.mxu0 }
  0xe9   :  { %258 = vmatmul.mubr.bf16.vlgmr.msra.gmra.mxu1 %v132_v58  ;;  %v3384_v58 = vld [vmem:[#allocation4 + $0x54] ss:$8 sps:$4 sm:$0xff]   ;;  %v3382_v60 = vld [vmem:[#allocation4 + $0x50] ss:$8 sps:$4 sm:$0xff]  }
  0xea   :  { %718 = vmatpush1.bf16.msra.mxu1 %v3277_v57  ;;  %v3379_v57 = vld [vmem:[#allocation4 + $0x160] ss:$8 sps:$4 sm:$0xff]  }
  0xeb   :  { %719 = vmatprep.subr.bf16.mxu1 %v3285_v59  ;;  %v3387_v59 = vld [vmem:[#allocation4 + $0x154] ss:$8 sps:$4 sm:$0xff]  }
  0xee   :  { %720 = vmatpush1.bf16.msra.mxu1 %v3283_v61  ;;  %v3385_v61 = vld [vmem:[#allocation4 + $0x150] ss:$8 sps:$4 sm:$0xff]  }
  0xef   :  { %721 = vmatprep.subr.bf16.mxu1 %v3291_v62  ;;  %v3390_v62 = vld [vmem:[#allocation4 + $0x44] ss:$8 sps:$4 sm:$0xff]  }
  0xf2   :  { %722 = vmatpush1.bf16.msra.mxu1 %v3289_v63  ;;  %v3393_v63 = vld [vmem:[#allocation4 + $0x144] ss:$8 sps:$4 sm:$0xff]  }
  0xf3   :  { %723 = vmatprep.subr.bf16.mxu1 %v3297_v1  ;;  %v3388_v1 = vld [vmem:[#allocation4 + $0x40] ss:$8 sps:$4 sm:$0xff]  }
  0xf6   :  { %724 = vmatpush1.bf16.msra.mxu1 %v3295_v2  ;;  %v3391_v2 = vld [vmem:[#allocation4 + $0x140] ss:$8 sps:$4 sm:$0xff]  }
  0xf7   :  { %725 = vmatprep.subr.bf16.mxu1 %v3303_v3  ;;  %v3396_v3 = vld [vmem:[#allocation4 + $0x34] ss:$8 sps:$4 sm:$0xff]  }
  0xfa   :  { %726 = vmatpush1.bf16.msra.mxu1 %v3301_v5  ;;  %v3399_v5 = vld [vmem:[#allocation4 + $0x134] ss:$8 sps:$4 sm:$0xff]  }
  0xfb   :  { %727 = vmatprep.subr.bf16.mxu1 %v3309_v6  ;;  %v3394_v6 = vld [vmem:[#allocation4 + $0x30] ss:$8 sps:$4 sm:$0xff]  }
  0xfe   :  { %728 = vmatpush1.bf16.msra.mxu1 %v3307_v7  ;;  %v3397_v7 = vld [vmem:[#allocation4 + $0x130] ss:$8 sps:$4 sm:$0xff]  }
  0xff   :  { %729 = vmatprep.subr.bf16.mxu1 %v3315_v8  ;;  %v3402_v8 = vld [vmem:[#allocation4 + $0x24] ss:$8 sps:$4 sm:$0xff]  }
 0x102   :  { %730 = vmatpush1.bf16.msra.mxu1 %v3313_v9  ;;  %v3405_v9 = vld [vmem:[#allocation4 + $0x124] ss:$8 sps:$4 sm:$0xff]  }
 0x103   :  { %731 = vmatprep.subr.bf16.mxu1 %v3321_v10  ;;  %v3400_v10 = vld [vmem:[#allocation4 + $0x20] ss:$8 sps:$4 sm:$0xff]  }
 0x106   :  { %732 = vmatpush1.bf16.msra.mxu1 %v3319_v11  ;;  %v3403_v11 = vld [vmem:[#allocation4 + $0x120] ss:$8 sps:$4 sm:$0xff]  }
 0x107   :  { %733 = vmatprep.subr.bf16.mxu1 %v3327_v12  ;;  %v3408_v12 = vld [vmem:[#allocation4 + $0x14] ss:$8 sps:$4 sm:$0xff]  }
 0x10a   :  { %734 = vmatpush2.bf16.msra.mxu1 %v3325_v13  ;;  %v3411_v13 = vld [vmem:[#allocation4 + $0x114] ss:$8 sps:$4 sm:$0xff]  }
 0x10b   :  { %735 = vmatprep.subr.bf16.mxu1 %v3333_v14  ;;  %v3406_v14 = vld [vmem:[#allocation4 + $0x10] ss:$8 sps:$4 sm:$0xff]  }
 0x10e   :  { %736 = vmatpush2.bf16.msra.mxu1 %v3331_v15  ;;  %v3409_v15 = vld [vmem:[#allocation4 + $0x110] ss:$8 sps:$4 sm:$0xff]  }
 0x10f   :  { %737 = vmatprep.subr.bf16.mxu1 %v3339_v16  ;;  %v3414_v16 = vld [vmem:[#allocation4 + $0x4] ss:$8 sps:$4 sm:$0xff]  }
 0x112   :  { %738 = vmatpush2.bf16.msra.mxu1 %v3337_v17  ;;  %v3417_v17 = vld [vmem:[#allocation4 + $0x104] ss:$8 sps:$4 sm:$0xff]  }
 0x113   :  { %739 = vmatprep.subr.bf16.mxu1 %v3345_v18  ;;  %v3412_v18 = vld [vmem:[#allocation4] ss:$8 sps:$4 sm:$0xff]  }
 0x116   :  { %740 = vmatpush2.bf16.msra.mxu1 %v3343_v19  ;;  %v3415_v19 = vld [vmem:[#allocation4 + $0x100] ss:$8 sps:$4 sm:$0xff]  }
 0x117   :  { %741 = vmatprep.subr.bf16.mxu1 %v3351_v20  ;;  %v3420_v20 = vld [vmem:[#allocation4 + $0xf4] ss:$8 sps:$4 sm:$0xff]  }
 0x11a   :  { %742 = vmatpush2.bf16.msra.mxu1 %v3349_v22  ;;  %v3423_v22 = vld [vmem:[#allocation4 + $0x1f4] ss:$8 sps:$4 sm:$0xff]  }
 0x11b   :  { %743 = vmatprep.subr.bf16.mxu1 %v3357_v23  ;;  %v3418_v23 = vld [vmem:[#allocation4 + $0xf0] ss:$8 sps:$4 sm:$0xff]  }
 0x11e   :  { %744 = vmatpush2.bf16.msra.mxu1 %v3355_v24  ;;  %v3421_v24 = vld [vmem:[#allocation4 + $0x1f0] ss:$8 sps:$4 sm:$0xff]  }
 0x11f   :  { %745 = vmatprep.subr.bf16.mxu1 %v3363_v26  ;;  %v3429_v26 = vld [vmem:[#allocation4 + $0x1e4] ss:$8 sps:$4 sm:$0xff]  }
 0x122   :  { %746 = vmatpush2.bf16.msra.mxu1 %v3361_v28  ;;  %v3427_v28 = vld [vmem:[#allocation4 + $0x1e0] ss:$8 sps:$4 sm:$0xff]  }
 0x123   :  { %747 = vmatprep.subr.bf16.mxu1 %v3369_v30  ;;  %v3435_v30 = vld [vmem:[#allocation4 + $0x1d4] ss:$8 sps:$4 sm:$0xff]  }
 0x126   :  { %748 = vmatpush2.bf16.msra.mxu1 %v3367_v32  ;;  %v3433_v32 = vld [vmem:[#allocation4 + $0x1d0] ss:$8 sps:$4 sm:$0xff]  }
 0x127   :  { %1203 = vmatprep.subr.bf16.mxu1 %v3375_v34  ;;  %v3441_v34 = vld [vmem:[#allocation4 + $0x1c4] ss:$8 sps:$4 sm:$0xff]  }
 0x1a9   :  { %v259_v42 = vpop.f32.mrf.mxu1 }
 0x1aa   :  { %v260_v43 = vadd.f32 %v259_v42, %v138_v40  ;;  %v3444_v40 = vld [vmem:[#allocation4 + $0xb4] ss:$8 sps:$4 sm:$0xff]   ;;  %v3442_v42 = vld [vmem:[#allocation4 + $0xb0] ss:$8 sps:$4 sm:$0xff]  }
 0x1ab   :  { %v261_v44 = vpop.f32.mrf.mxu1 }
 0x1ac   :  { %v262_v45 = vadd.f32 %v261_v44, %v142_v41  ;;  %v266_v46 = vmax.f32 %v260_v43, 0.0  ;;  %v3447_v41 = vld [vmem:[#allocation4 + $0x1b4] ss:$8 sps:$4 sm:$0xff]   ;;  %v3445_v43 = vld [vmem:[#allocation4 + $0x1b0] ss:$8 sps:$4 sm:$0xff]  }
 0x1ad   :  { %v263_v47 = vpop.f32.mrf.mxu1  ;;  %v3450_v44 = vld [vmem:[#allocation4 + $0xa4] ss:$8 sps:$4 sm:$0xff]  }
 0x1ae   :  { %v267_v48 = vmax.f32 %v262_v45, 0.0  ;;  %v332_v53 = vpack.c.bf16 %v266_v46, %v266_v46  ;;  %v3453_v45 = vld [vmem:[#allocation4 + $0x1a4] ss:$8 sps:$4 sm:$0xff]   ;;  %v3448_v46 = vld [vmem:[#allocation4 + $0xa0] ss:$8 sps:$4 sm:$0xff]  }
 0x1af   :  { %v264_v49 = vpop.f32.mrf.mxu1  ;;  %v3451_v47 = vld [vmem:[#allocation4 + $0x1a0] ss:$8 sps:$4 sm:$0xff]  }
 0x1b0   :  { %v333_v50 = vpack.c.bf16 %v267_v48, %v267_v48  ;;  %v3456_v48 = vld [vmem:[#allocation4 + $0x94] ss:$8 sps:$4 sm:$0xff]  }
 0x1b1   :  { %v3459_v49 = vld [vmem:[#allocation4 + $0x194] ss:$8 sps:$4 sm:$0xff]  }
 0x1b2   :  { %708 = vmatprep.mubr.bf16.mxu0 %v333_v50  ;;  %749 = vmatprep.mubr.bf16.mxu1 %v333_v50  ;;  %v3454_v50 = vld [vmem:[#allocation4 + $0x90] ss:$8 sps:$4 sm:$0xff]  }
 0x1b3   :  { %709 = vmatmul.mubr.bf16.vlgmr.msra.gmra.mxu0 %v332_v53  ;;  %750 = vmatmul.mubr.bf16.vlgmr.msra.gmra.mxu1 %v332_v53  ;;  %v3465_v53 = vld [vmem:[#allocation4 + $0x184] ss:$8 sps:$4 sm:$0xff]  }
 0x1b4   :  { %1163 = vmatpush1.bf16.msra.mxu0 %v3370_v51  ;;  %1204 = vmatpush1.bf16.msra.mxu1 %v3373_v52  ;;  %v3457_v51 = vld [vmem:[#allocation4 + $0x190] ss:$8 sps:$4 sm:$0xff]   ;;  %v3462_v52 = vld [vmem:[#allocation4 + $0x84] ss:$8 sps:$4 sm:$0xff]  }
 0x1b5   :  { %1164 = vmatprep.subr.bf16.mxu0 %v3378_v54  ;;  %1205 = vmatprep.subr.bf16.mxu1 %v3381_v55  ;;  %v3460_v54 = vld [vmem:[#allocation4 + $0x80] ss:$8 sps:$4 sm:$0xff]  }
 0x1b6   :  { %v3463_v55 = vld [vmem:[#allocation4 + $0x180] ss:$8 sps:$4 sm:$0xff]  }
 0x1b8   :  { %1165 = vmatpush1.bf16.msra.mxu0 %v3376_v56  ;;  %1206 = vmatpush1.bf16.msra.mxu1 %v3379_v57  ;;  %v3466_v56 = vld [vmem:[%s4108_s5 + $0x78] sm:$0xff]   ;;  %v346_v57 = vsub.s32 2, %v3884_v36 }
 0x1b9   :  { %1166 = vmatprep.subr.bf16.mxu0 %v3384_v58  ;;  %1207 = vmatprep.subr.bf16.mxu1 %v3387_v59  ;;  %v334_v58 = vld [vmem:[%s4109_s6 + $0x3] sm:$0xf]  ;;  %v350_v59 = vsub.s32 3, %v3884_v36  ;;  %v3699_v36 = vld [vmem:[%s4108_s5 + $0xb8] sm:$0xff]  }
 0x1bc   :  { %1167 = vmatpush1.bf16.msra.mxu0 %v3382_v60  ;;  %1208 = vmatpush1.bf16.msra.mxu1 %v3385_v61  ;;  %v339_v60 = vrot.slane %v334_v58, %v3887_v37  ;;  %v347_v61 = vrot.slane %v334_v58, %v346_v57 }
 0x1bd   :  { %1168 = vmatprep.subr.bf16.mxu0 %v3390_v62  ;;  %1209 = vmatprep.subr.bf16.mxu1 %v3393_v63  ;;  %v343_v62 = vrot.slane %v334_v58, %v3893_v39  ;;  %v351_v63 = vrot.slane %v334_v58, %v350_v59 }
 0x1c0   :  { %1169 = vmatpush1.bf16.msra.mxu0 %v3388_v1  ;;  %1210 = vmatpush1.bf16.msra.mxu1 %v3391_v2 }
 0x1c1   :  { %1170 = vmatprep.subr.bf16.mxu0 %v3396_v3  ;;  %1211 = vmatprep.subr.bf16.mxu1 %v3399_v5 }
 0x1c4   :  { %1171 = vmatpush1.bf16.msra.mxu0 %v3394_v6  ;;  %1212 = vmatpush1.bf16.msra.mxu1 %v3397_v7 }
 0x1c5   :  { %1172 = vmatprep.subr.bf16.mxu0 %v3402_v8  ;;  %1213 = vmatprep.subr.bf16.mxu1 %v3405_v9 }
 0x1c8   :  { %1173 = vmatpush1.bf16.msra.mxu0 %v3400_v10  ;;  %1214 = vmatpush1.bf16.msra.mxu1 %v3403_v11 }
 0x1c9   :  { %1174 = vmatprep.subr.bf16.mxu0 %v3408_v12  ;;  %1215 = vmatprep.subr.bf16.mxu1 %v3411_v13 }
 0x1cc   :  { %1175 = vmatpush1.bf16.msra.mxu0 %v3406_v14  ;;  %1216 = vmatpush1.bf16.msra.mxu1 %v3409_v15  ;;  %v2964_v14 = vld [vmem:[%s4104_s1 + $0x4] sm:$0xf] }
 0x1cd   :  { %1176 = vmatprep.subr.bf16.mxu0 %v3414_v16  ;;  %1217 = vmatprep.subr.bf16.mxu1 %v3417_v17 }
 0x1d0   :  { %1177 = vmatpush1.bf16.msra.mxu0 %v3412_v18  ;;  %1218 = vmatpush1.bf16.msra.mxu1 %v3415_v19 }
 0x1d1   :  { %1178 = vmatprep.subr.bf16.mxu0 %v3420_v20  ;;  %1219 = vmatprep.subr.bf16.mxu1 %v3423_v22  ;;  %v1436_v22 = vsel %vm71_vm1, %v2964_v14, 0 }
 0x1d4   :  { %1179 = vmatpush2.bf16.msra.mxu0 %v3418_v23  ;;  %1220 = vmatpush2.bf16.msra.mxu1 %v3421_v24 }
 0x1d5   :  { %1180 = vmatprep.subr.bf16.mxu0 %v3426_v25  ;;  %1221 = vmatprep.subr.bf16.mxu1 %v3429_v26  ;;  %v3467_v25 = vld [vmem:[%s4108_s5 + $0x38] sm:$0xff]   ;;  %v3468_v26 = vld [vmem:[%s4108_s5 + $0x70] sm:$0xff]  }
 0x1d8   :  { %1181 = vmatpush2.bf16.msra.mxu0 %v3424_v27  ;;  %1222 = vmatpush2.bf16.msra.mxu1 %v3427_v28  ;;  %v3469_v27 = vld [vmem:[%s4108_s5 + $0x30] sm:$0xff]   ;;  %v3470_v28 = vld [vmem:[%s4108_s5 + $0x68] sm:$0xff]  }
 0x1d9   :  { %1182 = vmatprep.subr.bf16.mxu0 %v3432_v29  ;;  %1223 = vmatprep.subr.bf16.mxu1 %v3435_v30  ;;  %v3471_v29 = vld [vmem:[%s4108_s5 + $0x28] sm:$0xff]   ;;  %v3473_v30 = vld [vmem:[%s4108_s5 + $0x20] sm:$0xff]  }
 0x1dc   :  { %1183 = vmatpush2.bf16.msra.mxu0 %v3430_v31  ;;  %1224 = vmatpush2.bf16.msra.mxu1 %v3433_v32  ;;  %v3474_v31 = vld [vmem:[%s4108_s5 + $0x58] sm:$0xff]  }
 0x1dd   :  { %1184 = vmatprep.subr.bf16.mxu0 %v3438_v33  ;;  %1225 = vmatprep.subr.bf16.mxu1 %v3441_v34  ;;  %v3475_v32 = vld [vmem:[%s4108_s5 + $0x18] sm:$0xff]   ;;  %v3477_v33 = vld [vmem:[%s4108_s5 + $0x10] sm:$0xff]   ;;  %v3478_v34 = vld [vmem:[%s4108_s5 + $0x48] sm:$0xff]  }
 0x1e0   :  { %1185 = vmatpush2.bf16.msra.mxu0 %v3436_v35  ;;  %1226 = vmatpush2.bf16.msra.mxu1 %v3439_v38  ;;  %v3479_v35 = vld [vmem:[%s4108_s5 + $0x8] sm:$0xff]   ;;  %v3480_v38 = vld [vmem:[%s4108_s5 + $0x40] sm:$0xff]  }
 0x1e1   :  { %1186 = vmatprep.subr.bf16.mxu0 %v3444_v40  ;;  %1227 = vmatprep.subr.bf16.mxu1 %v3447_v41  ;;  %v3481_v40 = vld [vmem:[%s4108_s5] sm:$0xff]   ;;  %v3484_v41 = vld [vmem:[%s4105_s2 + $0xf4] ss:$8 sps:$4 sm:$0xff]  }
 0x1e4   :  { %1187 = vmatpush2.bf16.msra.mxu0 %v3442_v42  ;;  %1228 = vmatpush2.bf16.msra.mxu1 %v3445_v43  ;;  %v3506_v42 = vld [vmem:[#allocation2 + $0x2e0] ss:$16 sps:$4 sm:$0xff]   ;;  %v3508_v43 = vld [vmem:[#allocation2 + $0x2e4] ss:$16 sps:$4 sm:$0xff]  }
 0x1e5   :  { %1188 = vmatprep.subr.bf16.mxu0 %v3450_v44  ;;  %1229 = vmatprep.subr.bf16.mxu1 %v3453_v45  ;;  %v3514_v44 = vld [vmem:[#allocation2 + $0x2c4] ss:$16 sps:$4 sm:$0xff]   ;;  %v3512_v45 = vld [vmem:[#allocation2 + $0x2c0] ss:$16 sps:$4 sm:$0xff]  }
 0x1e8   :  { %1189 = vmatpush2.bf16.msra.mxu0 %v3448_v46  ;;  %1230 = vmatpush2.bf16.msra.mxu1 %v3451_v47  ;;  %v3520_v46 = vld [vmem:[#allocation2 + $0x2a4] ss:$16 sps:$4 sm:$0xff]   ;;  %v3518_v47 = vld [vmem:[#allocation2 + $0x2a0] ss:$16 sps:$4 sm:$0xff]  }
 0x1e9   :  { %1190 = vmatprep.subr.bf16.mxu0 %v3456_v48  ;;  %1231 = vmatprep.subr.bf16.mxu1 %v3459_v49  ;;  %v3526_v48 = vld [vmem:[#allocation2 + $0x284] ss:$16 sps:$4 sm:$0xff]   ;;  %v3524_v49 = vld [vmem:[#allocation2 + $0x280] ss:$16 sps:$4 sm:$0xff]  }
 0x1ec   :  { %1191 = vmatpush2.bf16.msra.mxu0 %v3454_v50  ;;  %1232 = vmatpush2.bf16.msra.mxu1 %v3457_v51  ;;  %v3532_v50 = vld [vmem:[#allocation2 + $0x264] ss:$16 sps:$4 sm:$0xff]   ;;  %v3530_v51 = vld [vmem:[#allocation2 + $0x260] ss:$16 sps:$4 sm:$0xff]  }
 0x1ed   :  { %1192 = vmatprep.subr.bf16.mxu0 %v3462_v52  ;;  %1233 = vmatprep.subr.bf16.mxu1 %v3465_v53  ;;  %v3538_v52 = vld [vmem:[#allocation2 + $0x244] ss:$16 sps:$4 sm:$0xff]   ;;  %v3536_v53 = vld [vmem:[#allocation2 + $0x240] ss:$16 sps:$4 sm:$0xff]  }
 0x1f0   :  { %1193 = vmatpush2.bf16.msra.mxu0 %v3460_v54  ;;  %1234 = vmatpush2.bf16.msra.mxu1 %v3463_v55  ;;  %v830_v54 = vld [vmem:[%s4109_s6 + $0x7] sm:$0x3] }
 0x1f1   :  { %3235 = vmatprep.subr.bf16.mxu1 %v3764_v0  ;;  %3183 = vmatprep.subr.bf16.mxu0 %v3466_v56  ;;  %v835_v55 = vrot.slane %v830_v54, %v3887_v37  ;;  %v839_v56 = vrot.slane %v830_v54, %v3893_v39  ;;  %v3553_v54 = vld [vmem:[#allocation2 + $0x20c] ss:$16 sps:$4 sm:$0xff]  }
 0x273   :  { %v710_v1 = vpop.f32.mrf.mxu0  ;;  %v751_v2 = vpop.f32.mrf.mxu1 }
 0x274   :  { %v711_v3 = vadd.f32 %v710_v1, %v339_v60  ;;  %v752_v5 = vadd.f32 %v751_v2, %v347_v61 }
 0x275   :  { %v712_v6 = vpop.f32.mrf.mxu0  ;;  %v753_v7 = vpop.f32.mrf.mxu1 }
 0x276   :  { %v713_v8 = vadd.f32 %v712_v6, %v343_v62  ;;  %v754_v9 = vadd.f32 %v753_v7, %v351_v63  ;;  %v758_v10 = vmax.f32 %v711_v3, 0.0  ;;  %v760_v11 = vmax.f32 %v752_v5, 0.0 }
 0x277   :  { %v714_v12 = vpop.f32.mrf.mxu0  ;;  %v755_v13 = vpop.f32.mrf.mxu1 }
 0x278   :  { %v759_v15 = vmax.f32 %v713_v8, 0.0  ;;  %v761_v16 = vmax.f32 %v754_v9, 0.0  ;;  %v826_v23 = vpack.c.bf16 %v758_v10, %v758_v10  ;;  %v828_v24 = vpack.c.bf16 %v760_v11, %v760_v11  ;;  %v3482_v13 = vld [vmem:[%s4105_s2 + $0xf0] ss:$8 sps:$4 sm:$0xff]  }
 0x279   :  { %v715_v17 = vpop.f32.mrf.mxu0  ;;  %v756_v18 = vpop.f32.mrf.mxu1 }
 0x27a   :  { %v827_v19 = vpack.c.bf16 %v759_v15, %v759_v15  ;;  %v829_v20 = vpack.c.bf16 %v761_v16, %v761_v16  ;;  %v3487_v15 = vld [vmem:[%s4105_s2 + $0xe4] ss:$8 sps:$4 sm:$0xff]   ;;  %v3485_v18 = vld [vmem:[%s4105_s2 + $0xe0] ss:$8 sps:$4 sm:$0xff]  }
 0x27c   :  { %1194 = vmatprep.mubr.bf16.mxu0 %v827_v19  ;;  %1235 = vmatprep.mubr.bf16.mxu1 %v829_v20  ;;  %v3490_v19 = vld [vmem:[%s4105_s2 + $0xd4] ss:$8 sps:$4 sm:$0xff]  }
 0x27d   :  { %1195 = vmatmul.mubr.bf16.vlgmr.msra.gmra.mxu0 %v826_v23  ;;  %1236 = vmatmul.mubr.bf16.vlgmr.msra.gmra.mxu1 %v828_v24  ;;  %v3493_v23 = vld [vmem:[%s4105_s2 + $0xc4] ss:$8 sps:$4 sm:$0xff]   ;;  %v3496_v24 = vld [vmem:[%s4105_s2 + $0xb4] ss:$8 sps:$4 sm:$0xff]  }
 0x27e   :  { %3236 = vmatpush3.bf16.msra.mxu1 %v1436_v22  ;;  %3237 = vmatprep.mubr.msk.bf16.mxu1 %vm3765_vm0, %v3764_v0  ;;  %v3472_v0 = vld [vmem:[%s4108_s5 + $0x60] sm:$0xff]   ;;  %v3488_v22 = vld [vmem:[%s4105_s2 + $0xd0] ss:$8 sps:$4 sm:$0xff]  }
 0x27f   :  { %3184 = vmatpush3.bf16.msra.mxu0 %v3467_v25  ;;  %2041 = vmatprep.subr.bf16.mxu1 %v3508_v43  ;;  %v3494_v25 = vld [vmem:[%s4105_s2 + $0xb0] ss:$8 sps:$4 sm:$0xff]   ;;  %v3529_v43 = vld [vmem:[#allocation2 + $0x28c] ss:$16 sps:$4 sm:$0xff]  }
 0x280   :  { %3185 = vmatprep.subr.bf16.mxu0 %v3468_v26  ;;  %v3499_v26 = vld [vmem:[%s4105_s2 + $0xa4] ss:$8 sps:$4 sm:$0xff]  }
 0x283   :  { %3186 = vmatpush3.bf16.msra.mxu0 %v3469_v27  ;;  %v2966_v27 = vld [vmem:[%s4109_s6 + $0xa] ss:$0 sm:$0xff] }
 0x284   :  { %3187 = vmatprep.subr.bf16.mxu0 %v3470_v28  ;;  %v3497_v28 = vld [vmem:[%s4105_s2 + $0xa0] ss:$8 sps:$4 sm:$0xff]  }
 0x285   :  { %3238 = vmatmul.mubr.msk.bf16.vlgmr.msra.gmra.mxu1 %vm67_vm2, %v3828_v4  ;;  %v3476_v4 = vld [vmem:[%s4108_s5 + $0x50] sm:$0xff]  }
 0x286   :  { %2042 = vmatpush1.bf16.msra.mxu1 %v3506_v42  ;;  %v3521_v42 = vld [vmem:[#allocation2 + $0x2a8] ss:$16 sps:$4 sm:$0xff]  }
 0x287   :  { %3188 = vmatpush3.bf16.msra.mxu0 %v3471_v29  ;;  %2043 = vmatprep.subr.bf16.mxu1 %v3514_v44  ;;  %v3502_v29 = vld [vmem:[%s4105_s2 + $0x94] ss:$8 sps:$4 sm:$0xff]   ;;  %v3527_v44 = vld [vmem:[#allocation2 + $0x288] ss:$16 sps:$4 sm:$0xff]  }
 0x288   :  { %3189 = vmatprep.subr.bf16.mxu0 %v3472_v0 }
 0x28a   :  { %2044 = vmatpush1.bf16.msra.mxu1 %v3512_v45  ;;  %v3535_v45 = vld [vmem:[#allocation2 + $0x26c] ss:$16 sps:$4 sm:$0xff]  }
 0x28b   :  { %3190 = vmatpush3.bf16.msra.mxu0 %v3473_v30  ;;  %2045 = vmatprep.subr.bf16.mxu1 %v3520_v46  ;;  %v3500_v30 = vld [vmem:[%s4105_s2 + $0x90] ss:$8 sps:$4 sm:$0xff]  }
 0x28c   :  { %3191 = vmatprep.subr.bf16.mxu0 %v3474_v31  ;;  %v3505_v31 = vld [vmem:[%s4105_s2 + $0x84] ss:$8 sps:$4 sm:$0xff]   ;;  %v3533_v46 = vld [vmem:[#allocation2 + $0x268] ss:$16 sps:$4 sm:$0xff]  }
 0x28e   :  { %2046 = vmatpush1.bf16.msra.mxu1 %v3518_v47  ;;  %v3541_v47 = vld [vmem:[#allocation2 + $0x24c] ss:$16 sps:$4 sm:$0xff]  }
 0x28f   :  { %3192 = vmatpush3.bf16.msra.mxu0 %v3475_v32  ;;  %2047 = vmatprep.subr.bf16.mxu1 %v3526_v48  ;;  %v3539_v48 = vld [vmem:[#allocation2 + $0x248] ss:$16 sps:$4 sm:$0xff]  }
 0x290   :  { %3193 = vmatprep.subr.bf16.mxu0 %v3476_v4  ;;  %v3503_v4 = vld [vmem:[%s4105_s2 + $0x80] ss:$8 sps:$4 sm:$0xff]  }
 0x292   :  { %2048 = vmatpush1.bf16.msra.mxu1 %v3524_v49  ;;  %v3542_v49 = vld [vmem:[#allocation2 + $0x220] ss:$16 sps:$4 sm:$0xff]  }
 0x293   :  { %3194 = vmatpush3.bf16.msra.mxu0 %v3477_v33  ;;  %2049 = vmatprep.subr.bf16.mxu1 %v3532_v50  ;;  %v3511_v33 = vld [vmem:[#allocation2 + $0x2ec] ss:$16 sps:$4 sm:$0xff]   ;;  %v3544_v50 = vld [vmem:[#allocation2 + $0x224] ss:$16 sps:$4 sm:$0xff]  }
 0x294   :  { %3195 = vmatprep.subr.bf16.mxu0 %v3478_v34 }
 0x296   :  { %2050 = vmatpush1.bf16.msra.mxu1 %v3530_v51  ;;  %v3545_v51 = vld [vmem:[#allocation2 + $0x228] ss:$16 sps:$4 sm:$0xff]  }
 0x297   :  { %3196 = vmatpush3.bf16.msra.mxu0 %v3479_v35  ;;  %2051 = vmatprep.subr.bf16.mxu1 %v3538_v52  ;;  %v3509_v35 = vld [vmem:[#allocation2 + $0x2e8] ss:$16 sps:$4 sm:$0xff]   ;;  %v3547_v52 = vld [vmem:[#allocation2 + $0x22c] ss:$16 sps:$4 sm:$0xff]  }
 0x298   :  { %3197 = vmatprep.subr.bf16.mxu0 %v3480_v38  ;;  %v3517_v38 = vld [vmem:[#allocation2 + $0x2cc] ss:$16 sps:$4 sm:$0xff]  }
 0x29a   :  { %2052 = vmatpush1.bf16.msra.mxu1 %v3536_v53  ;;  %v3550_v53 = vld [vmem:[#allocation2 + $0x204] ss:$16 sps:$4 sm:$0xff]  }
 0x29b   :  { %3198 = vmatpush3.bf16.msra.mxu0 %v3481_v40  ;;  %v3515_v40 = vld [vmem:[#allocation2 + $0x2c8] ss:$16 sps:$4 sm:$0xff]   ;;  %2053 = vmatprep.subr.bf16.mxu1 %v3544_v50 }
 0x29c   :  { %1589 = vmatprep.subr.bf16.mxu0 %v3484_v41  ;;  %v3523_v41 = vld [vmem:[#allocation2 + $0x2ac] ss:$16 sps:$4 sm:$0xff]  }
 0x29e   :  { %2054 = vmatpush1.bf16.msra.mxu1 %v3542_v49 }
 0x29f   :  { %2055 = vmatprep.subr.bf16.mxu1 %v3550_v53 }
 0x33d   :  { %v1196_v58 = vpop.f32.mrf.mxu0  ;;  %v1237_v60 = vpop.f32.mrf.mxu1 }
 0x33e   :  { %v1197_v61 = vadd.f32 %v1196_v58, %v835_v55  ;;  %v3548_v55 = vld [vmem:[#allocation2 + $0x200] ss:$16 sps:$4 sm:$0xff]  }
 0x33f   :  { %v1198_v62 = vpop.f32.mrf.mxu0  ;;  %v1239_v63 = vpop.f32.mrf.mxu1  ;;  %2056 = vmatpush1.bf16.msra.mxu1 %v3548_v55  ;;  %v3554_v58 = vld [vmem:[#allocation2 + $0x3e0] ss:$16 sps:$4 sm:$0xff]   ;;  %v3613_v55 = vld [vmem:[#allocation4 + $0x364] ss:$8 sps:$4 sm:$0xff]  }
 0x340   :  { %v1238_v1 = vadd.f32 %v1237_v60, %v1197_v61  ;;  %v1199_v2 = vadd.f32 %v1198_v62, %v839_v56  ;;  %v3551_v56 = vld [vmem:[#allocation2 + $0x208] ss:$16 sps:$4 sm:$0xff]   ;;  %v3556_v60 = vld [vmem:[#allocation2 + $0x3e4] ss:$16 sps:$4 sm:$0xff]   ;;  %v3559_v62 = vld [vmem:[#allocation2 + $0x3ec] ss:$16 sps:$4 sm:$0xff]  }
 0x341   :  { %v1200_v3 = vpop.f32.mrf.mxu0  ;;  %v1241_v5 = vpop.f32.mrf.mxu1  ;;  %v3557_v61 = vld [vmem:[#allocation2 + $0x3e8] ss:$16 sps:$4 sm:$0xff]   ;;  %2057 = vmatprep.subr.bf16.mxu1 %v3556_v60  ;;  %v3616_v60 = vld [vmem:[#allocation4 + $0x254] ss:$8 sps:$4 sm:$0xff]  }
 0x342   :  { %v1240_v6 = vadd.f32 %v1239_v63, %v1199_v2  ;;  %v1244_v7 = vmax.f32 %v1238_v1, 0.0  ;;  %v3562_v63 = vld [vmem:[#allocation2 + $0x3c4] ss:$16 sps:$4 sm:$0xff]   ;;  %v3565_v1 = vld [vmem:[#allocation2 + $0x3cc] ss:$16 sps:$4 sm:$0xff]  }
 0x343   :  { %v1201_v8 = vpop.f32.mrf.mxu0  ;;  %v1242_v9 = vpop.f32.mrf.mxu1  ;;  %2058 = vmatpush2.bf16.msra.mxu1 %v3554_v58  ;;  %v3560_v2 = vld [vmem:[#allocation2 + $0x3c0] ss:$16 sps:$4 sm:$0xff]   ;;  %v3563_v3 = vld [vmem:[#allocation2 + $0x3c8] ss:$16 sps:$4 sm:$0xff]   ;;  %v3568_v5 = vld [vmem:[#allocation2 + $0x3a4] ss:$16 sps:$4 sm:$0xff]  }
 0x344   :  { %v1245_v10 = vmax.f32 %v1240_v6, 0.0  ;;  %v1278_v14 = vpack.c.bf16 %v1244_v7, %v1244_v7  ;;  %2059 = vmatprep.subr.bf16.mxu1 %v3562_v63  ;;  %v3571_v6 = vld [vmem:[#allocation2 + $0x3ac] ss:$16 sps:$4 sm:$0xff]   ;;  %v3566_v7 = vld [vmem:[#allocation2 + $0x3a0] ss:$16 sps:$4 sm:$0xff]  }
 0x345   :  { %v1472_v11 = vpop.f32.mrf.mxu1  ;;  %v3569_v8 = vld [vmem:[#allocation2 + $0x3a8] ss:$16 sps:$4 sm:$0xff]   ;;  %v3574_v9 = vld [vmem:[#allocation2 + $0x384] ss:$16 sps:$4 sm:$0xff]  }
 0x346   :  { %v1279_v12 = vpack.c.bf16 %v1245_v10, %v1245_v10  ;;  %v1473_v0 = vadd.f32 %v2966_v27, %v1472_v11  ;;  %v3577_v10 = vld [vmem:[#allocation2 + $0x38c] ss:$16 sps:$4 sm:$0xff]   ;;  %v3572_v11 = vld [vmem:[#allocation2 + $0x380] ss:$16 sps:$4 sm:$0xff]  }
 0x347   :  { %v3239_v16 = vpop.f32.mrf.mxu1  ;;  %2060 = vmatpush2.bf16.msra.mxu1 %v3560_v2  ;;  %v3596_v27 = vld [vmem:[#allocation2 + $0x300] ss:$16 sps:$4 sm:$0xff]   ;;  %v3625_v2 = vld [vmem:[#allocation4 + $0x344] ss:$8 sps:$4 sm:$0xff]  }
 0x348   :  { %1415 = vmatprep.mubr.bf16.mxu0 %v1279_v12  ;;  %v1478_v32 = vmax.f32 %v1473_v0, 0.0  ;;  %2061 = vmatprep.subr.bf16.mxu1 %v3568_v5  ;;  %v3575_v12 = vld [vmem:[#allocation2 + $0x388] ss:$16 sps:$4 sm:$0xff]   ;;  %v3607_v0 = vld [vmem:[#allocation4 + $0x374] ss:$8 sps:$4 sm:$0xff]  }
 0x349   :  { %1416 = vmatmul.mubr.bf16.vlgmr.msra.gmra.mxu0 %v1278_v14  ;;  %v1475_v17 = vpop.f32.mrf.mxu1  ;;  %v3583_v14 = vld [vmem:[#allocation2 + $0x36c] ss:$16 sps:$4 sm:$0xff]   ;;  %v3581_v16 = vld [vmem:[#allocation2 + $0x368] ss:$16 sps:$4 sm:$0xff]  }
 0x34a   :  { %1590 = vmatpush1.bf16.msra.mxu0 %v3482_v13  ;;  %1621 = vmatprep.mubr.bf16.mxu0 %v3766_v21  ;;  %v3491_v21 = vld [vmem:[%s4105_s2 + $0xc0] ss:$8 sps:$4 sm:$0xff]   ;;  %v1496_v34 = vpack.c.bf16 %v1478_v32, %v1478_v32  ;;  %v3580_v13 = vld [vmem:[#allocation2 + $0x364] ss:$16 sps:$4 sm:$0xff]   ;;  %v3617_v63 = vld [vmem:[#allocation4 + $0x350] ss:$8 sps:$4 sm:$0xff]  }
 0x34b   :  { %1591 = vmatprep.subr.bf16.mxu0 %v3487_v15  ;;  %v3240_v20 = vpop.f32.mrf.mxu1  ;;  %2062 = vmatpush2.bf16.msra.mxu1 %v3566_v7  ;;  %v3578_v15 = vld [vmem:[#allocation2 + $0x360] ss:$16 sps:$4 sm:$0xff]   ;;  %v3586_v17 = vld [vmem:[#allocation2 + $0x344] ss:$16 sps:$4 sm:$0xff]  }
 0x34c   :  { %2063 = vmatprep.subr.bf16.mxu1 %v3574_v9  ;;  %v3587_v20 = vld [vmem:[#allocation2 + $0x348] ss:$16 sps:$4 sm:$0xff]   ;;  %v3631_v7 = vld [vmem:[#allocation4 + $0x334] ss:$8 sps:$4 sm:$0xff]  }
 0x34d   :  { %v3611_v58 = vld [vmem:[#allocation4 + $0x360] ss:$8 sps:$4 sm:$0xff]   ;;  %v3629_v9 = vld [vmem:[#allocation4 + $0x330] ss:$8 sps:$4 sm:$0xff]  }
 0x34e   :  { %1592 = vmatpush1.bf16.msra.mxu0 %v3485_v18  ;;  %v3589_v18 = vld [vmem:[#allocation2 + $0x34c] ss:$16 sps:$4 sm:$0xff]   ;;  %v3623_v5 = vld [vmem:[#allocation4 + $0x340] ss:$8 sps:$4 sm:$0xff]  }
 0x34f   :  { %1593 = vmatprep.subr.bf16.mxu0 %v3490_v19  ;;  %2064 = vmatpush2.bf16.msra.mxu1 %v3572_v11  ;;  %v3584_v19 = vld [vmem:[#allocation2 + $0x340] ss:$16 sps:$4 sm:$0xff]   ;;  %v3637_v11 = vld [vmem:[#allocation4 + $0x324] ss:$8 sps:$4 sm:$0xff]  }
 0x350   :  { %2065 = vmatprep.subr.bf16.mxu1 %v3580_v13  ;;  %v3635_v13 = vld [vmem:[#allocation4 + $0x320] ss:$8 sps:$4 sm:$0xff]  }
 0x352   :  { %1594 = vmatpush1.bf16.msra.mxu0 %v3488_v22  ;;  %v3592_v22 = vld [vmem:[#allocation2 + $0x324] ss:$16 sps:$4 sm:$0xff]  }
 0x353   :  { %1595 = vmatprep.subr.bf16.mxu0 %v3493_v23  ;;  %2066 = vmatpush2.bf16.msra.mxu1 %v3578_v15  ;;  %v3595_v23 = vld [vmem:[#allocation2 + $0x32c] ss:$16 sps:$4 sm:$0xff]  }
 0x354   :  { %2067 = vmatprep.subr.bf16.mxu1 %v3586_v17  ;;  %v3643_v15 = vld [vmem:[#allocation4 + $0x314] ss:$8 sps:$4 sm:$0xff]   ;;  %v3641_v17 = vld [vmem:[#allocation4 + $0x310] ss:$8 sps:$4 sm:$0xff]  }
 0x356   :  { %1596 = vmatpush1.bf16.msra.mxu0 %v3491_v21  ;;  %v3590_v21 = vld [vmem:[#allocation2 + $0x320] ss:$16 sps:$4 sm:$0xff]  }
 0x357   :  { %1597 = vmatprep.subr.bf16.mxu0 %v3496_v24  ;;  %2068 = vmatpush2.bf16.msra.mxu1 %v3584_v19  ;;  %v3593_v24 = vld [vmem:[#allocation2 + $0x328] ss:$16 sps:$4 sm:$0xff]   ;;  %v3649_v19 = vld [vmem:[#allocation4 + $0x304] ss:$8 sps:$4 sm:$0xff]  }
 0x358   :  { %2069 = vmatprep.subr.bf16.mxu1 %v3592_v22  ;;  %v3647_v22 = vld [vmem:[#allocation4 + $0x300] ss:$8 sps:$4 sm:$0xff]  }
 0x35a   :  { %1598 = vmatpush1.bf16.msra.mxu0 %v3494_v25  ;;  %v3598_v25 = vld [vmem:[#allocation2 + $0x304] ss:$16 sps:$4 sm:$0xff]  }
 0x35b   :  { %1599 = vmatprep.subr.bf16.mxu0 %v3499_v26  ;;  %2070 = vmatpush2.bf16.msra.mxu1 %v3590_v21  ;;  %v3601_v26 = vld [vmem:[#allocation2 + $0x30c] ss:$16 sps:$4 sm:$0xff]  }
 0x35c   :  { %2071 = vmatprep.subr.bf16.mxu1 %v3598_v25  ;;  %v3655_v21 = vld [vmem:[#allocation4 + $0x3f4] ss:$8 sps:$4 sm:$0xff]   ;;  %v3653_v25 = vld [vmem:[#allocation4 + $0x3f0] ss:$8 sps:$4 sm:$0xff]  }
 0x35e   :  { %1600 = vmatpush1.bf16.msra.mxu0 %v3497_v28  ;;  %v3599_v28 = vld [vmem:[#allocation2 + $0x308] ss:$16 sps:$4 sm:$0xff]  }
 0x35f   :  { %1601 = vmatprep.subr.bf16.mxu0 %v3502_v29  ;;  %2072 = vmatpush2.bf16.msra.mxu1 %v3596_v27  ;;  %v3604_v29 = vld [vmem:[#allocation4 + $0x274] ss:$8 sps:$4 sm:$0xff]   ;;  %v3661_v27 = vld [vmem:[#allocation4 + $0x3e4] ss:$8 sps:$4 sm:$0xff]  }
 0x360   :  { %2528 = vmatprep.subr.bf16.mxu1 %v3604_v29  ;;  %v3659_v29 = vld [vmem:[#allocation4 + $0x3e0] ss:$8 sps:$4 sm:$0xff]  }
 0x362   :  { %1602 = vmatpush1.bf16.msra.mxu0 %v3500_v30 }
 0x363   :  { %1603 = vmatprep.subr.bf16.mxu0 %v3505_v31  ;;  %v2947_v31 = vld [vmem:[%s4109_s6 + $0x9] ss:$0 sm:$0xff] }
 0x366   :  { %1604 = vmatpush1.bf16.msra.mxu0 %v3503_v4 }
 0x367   :  { %2082 = vmatprep.subr.bf16.mxu0 %v3511_v33 }
 0x369   :  { %1622 = vmatmul.mubr.bf16.vlgmr.msra.gmra.mxu0 %v1496_v34 }
 0x36a   :  { %2083 = vmatpush1.bf16.msra.mxu0 %v3509_v35 }
 0x36b   :  { %2084 = vmatprep.subr.bf16.mxu0 %v3517_v38  ;;  %v2984_v38 = vld [vmem:[%s4109_s6 + $0xb] sm:$0x3] }
 0x36e   :  { %2085 = vmatpush1.bf16.msra.mxu0 %v3515_v40  ;;  %v1502_v40 = vrot.slane %v2984_v38, %v3887_v37 }
 0x36f   :  { %2086 = vmatprep.subr.bf16.mxu0 %v3523_v41  ;;  %v1506_v41 = vrot.slane %v2984_v38, %v3893_v39  ;;  %v3676_v38 = vld [vmem:[#allocation4 + $0x2b4] ss:$8 sps:$4 sm:$0xff]  }
 0x372   :  { %2087 = vmatpush1.bf16.msra.mxu0 %v3521_v42 }
 0x373   :  { %2088 = vmatprep.subr.bf16.mxu0 %v3529_v43 }
 0x376   :  { %2089 = vmatpush1.bf16.msra.mxu0 %v3527_v44 }
 0x377   :  { %2090 = vmatprep.subr.bf16.mxu0 %v3535_v45 }
 0x37a   :  { %2091 = vmatpush1.bf16.msra.mxu0 %v3533_v46 }
 0x37b   :  { %2092 = vmatprep.subr.bf16.mxu0 %v3541_v47 }
 0x37e   :  { %2093 = vmatpush1.bf16.msra.mxu0 %v3539_v48 }
 0x37f   :  { %2094 = vmatprep.subr.bf16.mxu0 %v3547_v52  ;;  %v3605_v52 = vld [vmem:[#allocation4 + $0x370] ss:$8 sps:$4 sm:$0xff]  }
 0x382   :  { %2095 = vmatpush1.bf16.msra.mxu0 %v3545_v51  ;;  %v3602_v51 = vld [vmem:[#allocation4 + $0x270] ss:$8 sps:$4 sm:$0xff]  }
 0x383   :  { %2096 = vmatprep.subr.bf16.mxu0 %v3553_v54  ;;  %v3610_v54 = vld [vmem:[#allocation4 + $0x264] ss:$8 sps:$4 sm:$0xff]  }
 0x386   :  { %2097 = vmatpush1.bf16.msra.mxu0 %v3551_v56  ;;  %v3608_v56 = vld [vmem:[#allocation4 + $0x260] ss:$8 sps:$4 sm:$0xff]  }
 0x387   :  { %2098 = vmatprep.subr.bf16.mxu0 %v3559_v62  ;;  %v3614_v62 = vld [vmem:[#allocation4 + $0x250] ss:$8 sps:$4 sm:$0xff]  }
 0x38a   :  { %2099 = vmatpush2.bf16.msra.mxu0 %v3557_v61  ;;  %v3619_v61 = vld [vmem:[#allocation4 + $0x354] ss:$8 sps:$4 sm:$0xff]  }
 0x38b   :  { %2100 = vmatprep.subr.bf16.mxu0 %v3565_v1  ;;  %v3622_v1 = vld [vmem:[#allocation4 + $0x244] ss:$8 sps:$4 sm:$0xff]  }
 0x38e   :  { %2101 = vmatpush2.bf16.msra.mxu0 %v3563_v3  ;;  %v3620_v3 = vld [vmem:[#allocation4 + $0x240] ss:$8 sps:$4 sm:$0xff]  }
 0x38f   :  { %2102 = vmatprep.subr.bf16.mxu0 %v3571_v6  ;;  %v3628_v6 = vld [vmem:[#allocation4 + $0x234] ss:$8 sps:$4 sm:$0xff]  }
 0x392   :  { %2103 = vmatpush2.bf16.msra.mxu0 %v3569_v8  ;;  %v3626_v8 = vld [vmem:[#allocation4 + $0x230] ss:$8 sps:$4 sm:$0xff]  }
 0x393   :  { %2104 = vmatprep.subr.bf16.mxu0 %v3577_v10  ;;  %v3634_v10 = vld [vmem:[#allocation4 + $0x224] ss:$8 sps:$4 sm:$0xff]  }
 0x396   :  { %2105 = vmatpush2.bf16.msra.mxu0 %v3575_v12  ;;  %v3632_v12 = vld [vmem:[#allocation4 + $0x220] ss:$8 sps:$4 sm:$0xff]  }
 0x397   :  { %2106 = vmatprep.subr.bf16.mxu0 %v3583_v14  ;;  %v3640_v14 = vld [vmem:[#allocation4 + $0x214] ss:$8 sps:$4 sm:$0xff]  }
 0x39a   :  { %2107 = vmatpush2.bf16.msra.mxu0 %v3581_v16  ;;  %v3638_v16 = vld [vmem:[#allocation4 + $0x210] ss:$8 sps:$4 sm:$0xff]  }
 0x39b   :  { %2108 = vmatprep.subr.bf16.mxu0 %v3589_v18  ;;  %v3646_v18 = vld [vmem:[#allocation4 + $0x204] ss:$8 sps:$4 sm:$0xff]  }
 0x39e   :  { %2109 = vmatpush2.bf16.msra.mxu0 %v3587_v20  ;;  %v3644_v20 = vld [vmem:[#allocation4 + $0x200] ss:$8 sps:$4 sm:$0xff]  }
 0x39f   :  { %2110 = vmatprep.subr.bf16.mxu0 %v3595_v23  ;;  %v3652_v23 = vld [vmem:[#allocation4 + $0x2f4] ss:$8 sps:$4 sm:$0xff]  }
 0x3a2   :  { %2111 = vmatpush2.bf16.msra.mxu0 %v3593_v24  ;;  %v3650_v24 = vld [vmem:[#allocation4 + $0x2f0] ss:$8 sps:$4 sm:$0xff]  }
 0x3a3   :  { %2112 = vmatprep.subr.bf16.mxu0 %v3601_v26  ;;  %v3658_v26 = vld [vmem:[#allocation4 + $0x2e4] ss:$8 sps:$4 sm:$0xff]  }
 0x3a6   :  { %2113 = vmatpush2.bf16.msra.mxu0 %v3599_v28  ;;  %v3656_v28 = vld [vmem:[#allocation4 + $0x2e0] ss:$8 sps:$4 sm:$0xff]  }
 0x3a7   :  { %2569 = vmatprep.subr.bf16.mxu0 %v3607_v0  ;;  %v3664_v0 = vld [vmem:[#allocation4 + $0x2d4] ss:$8 sps:$4 sm:$0xff]  }
 0x409   :  { %v3199_v30 = vpop.f32.mrf.mxu0 }
 0x40b   :  { %v3200_v32 = vpop.f32.mrf.mxu0 }
 0x40c   :  { %v3201_v4 = vadd.f32 %v3200_v32, %v3199_v30  ;;  %v3667_v30 = vld [vmem:[#allocation4 + $0x3d4] ss:$8 sps:$4 sm:$0xff]   ;;  %v3665_v32 = vld [vmem:[#allocation4 + $0x3d0] ss:$8 sps:$4 sm:$0xff]  }
 0x40d   :  { %v3202_v33 = vpop.f32.mrf.mxu0 }
 0x40e   :  { %v1418_v34 = vadd.f32 %v3201_v4, %v2947_v31  ;;  %v3662_v31 = vld [vmem:[#allocation4 + $0x2d0] ss:$8 sps:$4 sm:$0xff]   ;;  %v3670_v4 = vld [vmem:[#allocation4 + $0x2c4] ss:$8 sps:$4 sm:$0xff]  }
 0x40f   :  { %v3203_v35 = vpop.f32.mrf.mxu0  ;;  %v3673_v33 = vld [vmem:[#allocation4 + $0x3c4] ss:$8 sps:$4 sm:$0xff]  }
 0x410   :  { %1424 = vst.msk [vmem:[%s4110_s7] sm:$0xff] %vm1423_vm3, %v1418_v34  ;;  %v3668_v34 = vld [vmem:[#allocation4 + $0x2c0] ss:$8 sps:$4 sm:$0xff]  }
 0x411   :  { %v3671_v35 = vld [vmem:[#allocation4 + $0x3c0] ss:$8 sps:$4 sm:$0xff]  }
 0x429   :  { %v1623_v42 = vpop.f32.mrf.mxu0 }
 0x42a   :  { %v1624_v43 = vadd.f32 %v1623_v42, %v1502_v40  ;;  %v3679_v40 = vld [vmem:[#allocation4 + $0x3b4] ss:$8 sps:$4 sm:$0xff]   ;;  %v3677_v42 = vld [vmem:[#allocation4 + $0x3b0] ss:$8 sps:$4 sm:$0xff]  }
 0x42b   :  { %v1625_v44 = vpop.f32.mrf.mxu0 }
 0x42c   :  { %v1626_v45 = vadd.f32 %v1625_v44, %v1506_v41  ;;  %v1630_v46 = vmax.f32 %v1624_v43, 0.0  ;;  %v3674_v41 = vld [vmem:[#allocation4 + $0x2b0] ss:$8 sps:$4 sm:$0xff]   ;;  %v3682_v43 = vld [vmem:[#allocation4 + $0x2a4] ss:$8 sps:$4 sm:$0xff]  }
 0x42d   :  { %v1627_v47 = vpop.f32.mrf.mxu0  ;;  %v3685_v44 = vld [vmem:[#allocation4 + $0x3a4] ss:$8 sps:$4 sm:$0xff]  }
 0x42e   :  { %v1631_v48 = vmax.f32 %v1626_v45, 0.0  ;;  %v1697_v53 = vpack.c.bf16 %v1630_v46, %v1630_v46  ;;  %v3680_v45 = vld [vmem:[#allocation4 + $0x2a0] ss:$8 sps:$4 sm:$0xff]   ;;  %v3688_v47 = vld [vmem:[#allocation4 + $0x294] ss:$8 sps:$4 sm:$0xff]  }
 0x42f   :  { %v1628_v49 = vpop.f32.mrf.mxu0  ;;  %v3683_v46 = vld [vmem:[#allocation4 + $0x3a0] ss:$8 sps:$4 sm:$0xff]  }
 0x430   :  { %v1698_v50 = vpack.c.bf16 %v1631_v48, %v1631_v48  ;;  %v3691_v48 = vld [vmem:[#allocation4 + $0x394] ss:$8 sps:$4 sm:$0xff]   ;;  %v3686_v49 = vld [vmem:[#allocation4 + $0x290] ss:$8 sps:$4 sm:$0xff]  }
 0x432   :  { %2073 = vmatprep.mubr.bf16.mxu1 %v1698_v50  ;;  %2114 = vmatprep.mubr.bf16.mxu0 %v1698_v50  ;;  %v3689_v50 = vld [vmem:[#allocation4 + $0x390] ss:$8 sps:$4 sm:$0xff]  }
 0x433   :  { %2074 = vmatmul.mubr.bf16.vlgmr.msra.gmra.mxu1 %v1697_v53  ;;  %2115 = vmatmul.mubr.bf16.vlgmr.msra.gmra.mxu0 %v1697_v53  ;;  %v3692_v53 = vld [vmem:[#allocation4 + $0x280] ss:$8 sps:$4 sm:$0xff]  }
 0x434   :  { %2529 = vmatpush1.bf16.msra.mxu1 %v3602_v51  ;;  %2570 = vmatpush1.bf16.msra.mxu0 %v3605_v52  ;;  %v3694_v51 = vld [vmem:[#allocation4 + $0x284] ss:$8 sps:$4 sm:$0xff]  }
 0x435   :  { %2530 = vmatprep.subr.bf16.mxu1 %v3610_v54  ;;  %2571 = vmatprep.subr.bf16.mxu0 %v3613_v55  ;;  %v3697_v52 = vld [vmem:[#allocation4 + $0x384] ss:$8 sps:$4 sm:$0xff]   ;;  %v3695_v54 = vld [vmem:[#allocation4 + $0x380] ss:$8 sps:$4 sm:$0xff]   ;;  %v3698_v55 = vld [vmem:[%s4108_s5 + $0xf8] sm:$0xff]  }
 0x438   :  { %2531 = vmatpush1.bf16.msra.mxu1 %v3608_v56  ;;  %2572 = vmatpush1.bf16.msra.mxu0 %v3611_v58  ;;  %v3001_v56 = vld [vmem:[%s4109_s6 + $0xd] sm:$0xf] }
 0x439   :  { %2532 = vmatprep.subr.bf16.mxu1 %v3616_v60  ;;  %2573 = vmatprep.subr.bf16.mxu0 %v3619_v61  ;;  %v1704_v58 = vrot.slane %v3001_v56, %v3887_v37  ;;  %v1712_v60 = vrot.slane %v3001_v56, %v346_v57  ;;  %v1708_v61 = vrot.slane %v3001_v56, %v3893_v39 }
 0x43c   :  { %2533 = vmatpush1.bf16.msra.mxu1 %v3614_v62  ;;  %2574 = vmatpush1.bf16.msra.mxu0 %v3617_v63  ;;  %v1716_v62 = vrot.slane %v3001_v56, %v350_v59 }
 0x43d   :  { %2534 = vmatprep.subr.bf16.mxu1 %v3622_v1  ;;  %2575 = vmatprep.subr.bf16.mxu0 %v3625_v2 }
 0x440   :  { %2535 = vmatpush1.bf16.msra.mxu1 %v3620_v3  ;;  %2576 = vmatpush1.bf16.msra.mxu0 %v3623_v5 }
 0x441   :  { %2536 = vmatprep.subr.bf16.mxu1 %v3628_v6  ;;  %2577 = vmatprep.subr.bf16.mxu0 %v3631_v7 }
 0x444   :  { %2537 = vmatpush1.bf16.msra.mxu1 %v3626_v8  ;;  %2578 = vmatpush1.bf16.msra.mxu0 %v3629_v9 }
 0x445   :  { %2538 = vmatprep.subr.bf16.mxu1 %v3634_v10  ;;  %2579 = vmatprep.subr.bf16.mxu0 %v3637_v11 }
 0x448   :  { %2539 = vmatpush1.bf16.msra.mxu1 %v3632_v12  ;;  %2580 = vmatpush1.bf16.msra.mxu0 %v3635_v13 }
 0x449   :  { %2540 = vmatprep.subr.bf16.mxu1 %v3640_v14  ;;  %2581 = vmatprep.subr.bf16.mxu0 %v3643_v15 }
 0x44c   :  { %2541 = vmatpush1.bf16.msra.mxu1 %v3638_v16  ;;  %2582 = vmatpush1.bf16.msra.mxu0 %v3641_v17 }
 0x44d   :  { %2542 = vmatprep.subr.bf16.mxu1 %v3646_v18  ;;  %2583 = vmatprep.subr.bf16.mxu0 %v3649_v19  ;;  %v3700_v19 = vld [vmem:[%s4108_s5 + $0xf0] sm:$0xff]  }
 0x450   :  { %2543 = vmatpush1.bf16.msra.mxu1 %v3644_v20  ;;  %2584 = vmatpush1.bf16.msra.mxu0 %v3647_v22  ;;  %v3701_v20 = vld [vmem:[%s4108_s5 + $0xb0] sm:$0xff]   ;;  %v3702_v22 = vld [vmem:[%s4108_s5 + $0xe8] sm:$0xff]  }
 0x451   :  { %2544 = vmatprep.subr.bf16.mxu1 %v3652_v23  ;;  %2585 = vmatprep.subr.bf16.mxu0 %v3655_v21  ;;  %v3703_v23 = vld [vmem:[%s4108_s5 + $0xa8] sm:$0xff]   ;;  %v3704_v21 = vld [vmem:[%s4108_s5 + $0xe0] sm:$0xff]  }
 0x454   :  { %2545 = vmatpush2.bf16.msra.mxu1 %v3650_v24  ;;  %2586 = vmatpush2.bf16.msra.mxu0 %v3653_v25  ;;  %v3705_v24 = vld [vmem:[%s4108_s5 + $0xa0] sm:$0xff]   ;;  %v3706_v25 = vld [vmem:[%s4108_s5 + $0xd8] sm:$0xff]  }
 0x455   :  { %2546 = vmatprep.subr.bf16.mxu1 %v3658_v26  ;;  %2587 = vmatprep.subr.bf16.mxu0 %v3661_v27  ;;  %v3707_v26 = vld [vmem:[%s4108_s5 + $0x98] sm:$0xff]   ;;  %v3708_v27 = vld [vmem:[%s4108_s5 + $0xd0] sm:$0xff]  }
 0x458   :  { %2547 = vmatpush2.bf16.msra.mxu1 %v3656_v28  ;;  %2588 = vmatpush2.bf16.msra.mxu0 %v3659_v29  ;;  %v3709_v28 = vld [vmem:[%s4108_s5 + $0x90] sm:$0xff]   ;;  %v3710_v29 = vld [vmem:[%s4108_s5 + $0xc8] sm:$0xff]  }
 0x459   :  { %2548 = vmatprep.subr.bf16.mxu1 %v3664_v0  ;;  %2589 = vmatprep.subr.bf16.mxu0 %v3667_v30  ;;  %v3711_v0 = vld [vmem:[%s4108_s5 + $0x88] sm:$0xff]   ;;  %v3712_v30 = vld [vmem:[%s4108_s5 + $0xc0] sm:$0xff]  }
 0x45c   :  { %2549 = vmatpush2.bf16.msra.mxu1 %v3662_v31  ;;  %2590 = vmatpush2.bf16.msra.mxu0 %v3665_v32  ;;  %v3713_v31 = vld [vmem:[%s4108_s5 + $0x80] sm:$0xff]   ;;  %v3066_v32 = vld [vmem:[%s4109_s6 + $0x11] sm:$0x3] }
 0x45d   :  { %2550 = vmatprep.subr.bf16.mxu1 %v3670_v4  ;;  %2591 = vmatprep.subr.bf16.mxu0 %v3673_v33  ;;  %v2201_v4 = vrot.slane %v3066_v32, %v3887_v37  ;;  %v2205_v33 = vrot.slane %v3066_v32, %v3893_v39  ;;  %v3164_v39 = vld [vmem:[%s4109_s6 + $0x13] ss:$0 sm:$0xff] }
 0x460   :  { %2551 = vmatpush2.bf16.msra.mxu1 %v3668_v34  ;;  %2592 = vmatpush2.bf16.msra.mxu0 %v3671_v35 }
 0x461   :  { %2552 = vmatprep.subr.bf16.mxu1 %v3676_v38  ;;  %2593 = vmatprep.subr.bf16.mxu0 %v3679_v40 }
 0x464   :  { %2553 = vmatpush2.bf16.msra.mxu1 %v3674_v41  ;;  %2594 = vmatpush2.bf16.msra.mxu0 %v3677_v42 }
 0x465   :  { %2554 = vmatprep.subr.bf16.mxu1 %v3682_v43  ;;  %2595 = vmatprep.subr.bf16.mxu0 %v3685_v44 }
 0x468   :  { %2555 = vmatpush2.bf16.msra.mxu1 %v3680_v45  ;;  %2596 = vmatpush2.bf16.msra.mxu0 %v3683_v46 }
 0x469   :  { %2556 = vmatprep.subr.bf16.mxu1 %v3688_v47  ;;  %2597 = vmatprep.subr.bf16.mxu0 %v3691_v48 }
 0x46c   :  { %2557 = vmatpush2.bf16.msra.mxu1 %v3686_v49  ;;  %2598 = vmatpush2.bf16.msra.mxu0 %v3689_v50 }
 0x46d   :  { %2558 = vmatprep.subr.bf16.mxu1 %v3694_v51  ;;  %2599 = vmatprep.subr.bf16.mxu0 %v3697_v52 }
 0x470   :  { %2559 = vmatpush2.bf16.msra.mxu1 %v3692_v53  ;;  %2600 = vmatpush2.bf16.msra.mxu0 %v3695_v54 }
 0x471   :  { %3207 = vmatprep.subr.bf16.mxu1 %v3698_v55 }
 0x4f3   :  { %v2075_v63 = vpop.f32.mrf.mxu1  ;;  %v2116_v1 = vpop.f32.mrf.mxu0 }
 0x4f4   :  { %v2076_v2 = vadd.f32 %v2075_v63, %v1704_v58  ;;  %v2117_v3 = vadd.f32 %v2116_v1, %v1712_v60 }
 0x4f5   :  { %v2077_v5 = vpop.f32.mrf.mxu1  ;;  %v2118_v6 = vpop.f32.mrf.mxu0 }
 0x4f6   :  { %v2078_v7 = vadd.f32 %v2077_v5, %v1708_v61  ;;  %v2119_v8 = vadd.f32 %v2118_v6, %v1716_v62  ;;  %v2123_v9 = vmax.f32 %v2076_v2, 0.0  ;;  %v2125_v10 = vmax.f32 %v2117_v3, 0.0 }
 0x4f7   :  { %v2079_v11 = vpop.f32.mrf.mxu1  ;;  %v2120_v12 = vpop.f32.mrf.mxu0 }
 0x4f8   :  { %v2124_v13 = vmax.f32 %v2078_v7, 0.0  ;;  %v2126_v14 = vmax.f32 %v2119_v8, 0.0  ;;  %v2192_v59 = vpack.c.bf16 %v2123_v9, %v2123_v9  ;;  %v2194_v18 = vpack.c.bf16 %v2125_v10, %v2125_v10 }
 0x4f9   :  { %v2080_v57 = vpop.f32.mrf.mxu1  ;;  %v2121_v15 = vpop.f32.mrf.mxu0 }
 0x4fa   :  { %v2193_v16 = vpack.c.bf16 %v2124_v13, %v2124_v13  ;;  %v2195_v17 = vpack.c.bf16 %v2126_v14, %v2126_v14 }
 0x4fc   :  { %2560 = vmatprep.mubr.bf16.mxu1 %v2193_v16  ;;  %2601 = vmatprep.mubr.bf16.mxu0 %v2195_v17 }
 0x4fd   :  { %2561 = vmatmul.mubr.bf16.vlgmr.msra.gmra.mxu1 %v2192_v59  ;;  %2602 = vmatmul.mubr.bf16.vlgmr.msra.gmra.mxu0 %v2194_v18 }
 0x4fe   :  { %3208 = vmatpush3.bf16.msra.mxu1 %v3699_v36 }
 0x4ff   :  { %3209 = vmatprep.subr.bf16.mxu1 %v3700_v19 }
 0x502   :  { %3210 = vmatpush3.bf16.msra.mxu1 %v3701_v20 }
 0x503   :  { %3211 = vmatprep.subr.bf16.mxu1 %v3702_v22 }
 0x506   :  { %3212 = vmatpush3.bf16.msra.mxu1 %v3703_v23 }
 0x507   :  { %3213 = vmatprep.subr.bf16.mxu1 %v3704_v21 }
 0x50a   :  { %3214 = vmatpush3.bf16.msra.mxu1 %v3705_v24 }
 0x50b   :  { %3215 = vmatprep.subr.bf16.mxu1 %v3706_v25 }
 0x50e   :  { %3216 = vmatpush3.bf16.msra.mxu1 %v3707_v26 }
 0x50f   :  { %3217 = vmatprep.subr.bf16.mxu1 %v3708_v27 }
 0x512   :  { %3218 = vmatpush3.bf16.msra.mxu1 %v3709_v28 }
 0x513   :  { %3219 = vmatprep.subr.bf16.mxu1 %v3710_v29 }
 0x516   :  { %3220 = vmatpush3.bf16.msra.mxu1 %v3711_v0 }
 0x517   :  { %3221 = vmatprep.subr.bf16.mxu1 %v3712_v30 }
 0x51a   :  { %3222 = vmatpush3.bf16.msra.mxu1 %v3713_v31 }
 0x5bd   :  { %v2562_v34 = vpop.f32.mrf.mxu1  ;;  %v2603_v35 = vpop.f32.mrf.mxu0 }
 0x5be   :  { %v2563_v38 = vadd.f32 %v2562_v34, %v2201_v4 }
 0x5bf   :  { %v2564_v40 = vpop.f32.mrf.mxu1  ;;  %v2605_v41 = vpop.f32.mrf.mxu0 }
 0x5c0   :  { %v2604_v42 = vadd.f32 %v2603_v35, %v2563_v38  ;;  %v2565_v43 = vadd.f32 %v2564_v40, %v2205_v33 }
 0x5c1   :  { %v2566_v44 = vpop.f32.mrf.mxu1  ;;  %v2607_v45 = vpop.f32.mrf.mxu0 }
 0x5c2   :  { %v2606_v46 = vadd.f32 %v2605_v41, %v2565_v43  ;;  %v2610_v47 = vmax.f32 %v2604_v42, 0.0 }
 0x5c3   :  { %v2567_v48 = vpop.f32.mrf.mxu1  ;;  %v2608_v49 = vpop.f32.mrf.mxu0 }
 0x5c4   :  { %v2611_v50 = vmax.f32 %v2606_v46, 0.0  ;;  %v2645_v52 = vpack.c.bf16 %v2610_v47, %v2610_v47 }
 0x5c6   :  { %v2646_v51 = vpack.c.bf16 %v2611_v50, %v2611_v50 }
 0x5c8   :  { %2782 = vmatprep.mubr.bf16.mxu1 %v2646_v51 }
 0x5c9   :  { %2783 = vmatmul.mubr.bf16.vlgmr.msra.gmra.mxu1 %v2645_v52 }
 0x689   :  { %v3223_v37 = vpop.f32.mrf.mxu1 }
 0x68b   :  { %v3224_v53 = vpop.f32.mrf.mxu1 }
 0x68c   :  { %v3225_v54 = vadd.f32 %v3224_v53, %v3223_v37 }
 0x68d   :  { %v3226_v55 = vpop.f32.mrf.mxu1 }
 0x68e   :  { %v2785_v56 = vadd.f32 %v3225_v54, %v3164_v39 }
 0x68f   :  { %v3227_v58 = vpop.f32.mrf.mxu1 }
 0x690   :  { %2790 = vst.msk [vmem:[%s4111_s8] sm:$0xff] %vm1423_vm3, %v2785_v56 }
 0x691   :  { %2799 = vsyncpa [#allocation3], 1 }
 0x692   :  { %2800 = vsyncpa [#allocation5], 1 }

</bundles_post_ra>
